<compile_context>
chip_gen: v6e
topology: v6e:2x2x1
jax: 0.10.0
libtpu: 0.0.40
codegen_flags: <defaults>
</compile_context>

<pallas_src>
import functools

import jax
import jax.numpy as jnp
from jax import lax
from jax.experimental import pallas as pl
from jax.experimental.pallas import tpu as pltpu


# ----------------------------------------------------------------------------
# Fused Pallas kernel: all LSTM layers + final Linear, one batch tile per call
# ----------------------------------------------------------------------------
def fused_lstm_fc_kernel(x_ref, *refs, num_layers, time_chunk, hidden, unroll):
    """Ref layout after x_ref (x block is (S, Bt, Din), time-major):
      per layer l : w_ih_t (Din_l, 4H), w_hh_t (H, 4H), b (1, 4H)
      then        : w_fc_t (H, C), b_fc (1, C)
      then        : out_ref (Bt, C)
      scratch     : gbuf (Tc, Bt, 4H), seq_buf (S, Bt, H)
    """
    S, Bt, _ = x_ref.shape
    H, Tc = hidden, time_chunk
    n_chunks = S // Tc
    n_w = 3 * num_layers
    layer_refs = refs[:n_w]
    wfc_ref, bfc_ref, out_ref, gbuf, seq_buf = refs[n_w:n_w + 5]
    cdtype = wfc_ref.dtype        # matmul-operand dtype (bf16 prod / f32 check)

    def run_layer(layer_idx, wih_ref, whh_ref, b_ref, write_seq):
        h = jnp.zeros((Bt, H), jnp.float32)
        c = jnp.zeros((Bt, H), jnp.float32)

        # Static chunk loop: only (h, c) stay live across chunk boundaries.
        for ck in range(n_chunks):
            t0 = ck * Tc

            # (1) Hoisted input projection for this time chunk: one MXU matmul
            #     over Tc*Bt rows instead of Tc tiny matmuls on the serial path.
            if layer_idx == 0:
                inp = x_ref[t0:t0 + Tc].reshape(Tc * Bt, -1)          # cdtype
            else:
                inp = seq_buf[t0:t0 + Tc].reshape(Tc * Bt, H)         # cdtype
            gx = jnp.dot(inp, wih_ref[...], preferred_element_type=jnp.float32)
            gx = gx + b_ref[...]                                      # f32 bias
            gbuf[...] = gx.reshape(Tc, Bt, 4 * H).astype(gbuf.dtype)

            # (2) Serial recurrence: only h @ W_hh remains per step.
            def step(ti, carry):
                h, c = carry
                # TODO(synk): keep W_hh resident in MXU staging regs via
                # pltpu.matmul_push_rhs/acc_lhs/pop instead of re-streaming it.
                gates = gbuf[ti].astype(jnp.float32) + jnp.dot(
                    h.astype(cdtype), whh_ref[...],
                    preferred_element_type=jnp.float32)
                # Gate columns were repacked offline to [i, f, o, g]:
                sig = jax.nn.sigmoid(gates[:, :3 * H])   # one EUP stream
                g = jnp.tanh(gates[:, 3 * H:])           # one EUP stream
                c_new = sig[:, H:2 * H] * c + sig[:, :H] * g
                h_new = sig[:, 2 * H:3 * H] * jnp.tanh(c_new)
                if write_seq:  # last layer only needs h at t = S-1
                    seq_buf[t0 + ti] = h_new.astype(seq_buf.dtype)
                return h_new, c_new

            h, c = lax.fori_loop(0, Tc, step, (h, c),
                                 unroll=max(1, min(unroll, Tc)))
        return h

    # Layer stack: layer-to-layer activations stay in VMEM scratch (in-place).
    h_last = None
    for l in range(num_layers):
        wih_ref, whh_ref, b_ref = layer_refs[3 * l:3 * l + 3]
        h_last = run_layer(l, wih_ref, whh_ref, b_ref,
                           write_seq=(l < num_layers - 1))

    # (3) Fused final Linear on the last timestep's hidden state.
    out_ref[...] = (
        jnp.dot(h_last.astype(cdtype), wfc_ref[...],
                preferred_element_type=jnp.float32) + bfc_ref[...]
    ).astype(out_ref.dtype)


# ----------------------------------------------------------------------------
# Wrapper
# ----------------------------------------------------------------------------
def _pick_time_chunk(seq_len, target=64):
    if seq_len <= target:
        return seq_len
    for tc in range(target, 7, -1):            # prefer multiples of 8
        if seq_len % tc == 0 and tc % 8 == 0:
            return tc
    for tc in range(target, 0, -1):
        if seq_len % tc == 0:
            return tc
    return seq_len


@functools.partial(
    jax.jit,
    static_argnames=("num_layers", "hidden_size", "num_classes", "batch_tile",
                     "time_chunk", "unroll", "single_buffer_weights"),
)
def lstm_model_forward(x, params, *, num_layers, hidden_size, num_classes,
                       batch_tile=None, time_chunk=None, unroll=8,
                       single_buffer_weights=False):
    """x: (batch, seq, input_size) like the PyTorch batch_first module.
    Returns (batch, num_classes) logits (f32)."""
    B, S, Din = x.shape
    H, C = hidden_size, num_classes
    cdtype = params["fc"]["w_t"].dtype          # matmul-operand dtype

    # Batch tiling: >= 2 independent tiles lets v7x's two TensorCores split the
    # batch (neutral on v5e/v6e).  When splitting, Bt must be a multiple of 8
    # for the (8,128) BlockSpec divisibility rule on the output block.
    if batch_tile is None:
        batch_tile = B // 2 if (B % 16 == 0) else B
    Bt = batch_tile
    assert B % Bt == 0
    if Bt != B:
        assert Bt % 8 == 0, "batch_tile must be a multiple of 8 when < batch"
    n_b_tiles = B // Bt

    # Time chunking of the hoisted input projection (caps the pre-activation
    # scratch at (Tc, Bt, 4H) instead of (S, Bt, 4H)).
    Tc = time_chunk if time_chunk is not None else _pick_time_chunk(S)
    assert S % Tc == 0

    # Time-major x in the matmul-operand dtype (halves x HBM/VMEM traffic for
    # the bf16 path).  TODO(synk): fuse this transpose into the input DMA.
    x_tm = jnp.transpose(x, (1, 0, 2)).astype(cdtype)        # (S, B, Din)

    # Weights are grid-invariant; optionally drop their double-buffering.
    w_pipe = dict(pipeline_mode=pl.Buffered(1)) if single_buffer_weights else {}

    inputs = [x_tm]
    in_specs = [pl.BlockSpec((S, Bt, Din), lambda b: (0, b, 0))]
    for l in range(num_layers):
        p = params["lstm"][l]
        din_l = Din if l == 0 else H
        inputs += [p["w_ih_t"], p["w_hh_t"], p["b"]]
        in_specs += [
            pl.BlockSpec((din_l, 4 * H), lambda b: (0, 0), **w_pipe),
            pl.BlockSpec((H, 4 * H), lambda b: (0, 0), **w_pipe),
            pl.BlockSpec((1, 4 * H), lambda b: (0, 0), **w_pipe),
        ]
    inputs += [params["fc"]["w_t"], params["fc"]["b"]]
    in_specs += [
        pl.BlockSpec((H, C), lambda b: (0, 0), **w_pipe),
        pl.BlockSpec((1, C), lambda b: (0, 0), **w_pipe),
    ]

    # Explicit VMEM budget: scratch + weights (+double buffer) + 2x I/O blocks,
    # with headroom; default scoped limit (16/32 MiB) is too small for big S/H.
    wsz = jnp.dtype(cdtype).itemsize
    w_bytes = sum(
        ((Din if l == 0 else H) * 4 * H + H * 4 * H) * wsz + 4 * H * 4
        for l in range(num_layers)
    ) + H * C * wsz + C * 4
    w_bytes *= 1 if single_buffer_weights else 2
    io_bytes = 2 * (S * Bt * Din * wsz + Bt * C * 4)
    scratch_bytes = (Tc * Bt * 4 * H + S * Bt * H) * wsz
    est = w_bytes + io_bytes + scratch_bytes
    vmem_limit = int(min(max(int(est * 1.5) + (8 << 20), 32 << 20), 96 << 20))

    kernel = functools.partial(
        fused_lstm_fc_kernel,
        num_layers=num_layers, time_chunk=Tc, hidden=H, unroll=unroll)

    return pl.pallas_call(
        kernel,
        out_shape=jax.ShapeDtypeStruct((B, C), jnp.float32),
        grid=(n_b_tiles,),
        in_specs=in_specs,
        out_specs=pl.BlockSpec((Bt, C), lambda b: (b, 0)),
        scratch_shapes=[
            pltpu.VMEM((Tc, Bt, 4 * H), cdtype),   # per-chunk pre-activations
            pltpu.VMEM((S, Bt, H), cdtype),        # layer-to-layer activations
        ],
        compiler_params=pltpu.CompilerParams(
            dimension_semantics=("parallel",),      # batch tiles -> megacore
            vmem_limit_bytes=vmem_limit,
        ),
    )(*inputs)


# ----------------------------------------------------------------------------
# Parameter init (PyTorch-style U(-1/sqrt(H), 1/sqrt(H))) and kernel packing
# ----------------------------------------------------------------------------
def init_params(key, input_size, hidden_size, num_layers, num_classes):
    k = 1.0 / (hidden_size ** 0.5)
    lstm = []
    for l in range(num_layers):
        din = input_size if l == 0 else hidden_size
        key, k1, k2, k3, k4 = jax.random.split(key, 5)
        lstm.append({
            "w_ih": jax.random.uniform(k1, (4 * hidden_size, din), jnp.float32, -k, k),
            "w_hh": jax.random.uniform(k2, (4 * hidden_size, hidden_size), jnp.float32, -k, k),
            "b_ih": jax.random.uniform(k3, (4 * hidden_size,), jnp.float32, -k, k),
            "b_hh": jax.random.uniform(k4, (4 * hidden_size,), jnp.float32, -k, k),
        })
    key, k1, k2 = jax.random.split(key, 3)
    fc = {"w": jax.random.uniform(k1, (num_classes, hidden_size), jnp.float32, -k, k),
          "b": jax.random.uniform(k2, (num_classes,), jnp.float32, -k, k)}
    return {"lstm": lstm, "fc": fc}


def pack_params(raw, matmul_dtype):
    """Offline repack: transpose weights, combine biases, permute gate order
    from PyTorch's [i, f, g, o] to [i, f, o, g] (one sigmoid span, one tanh
    span), and cast the MXU operands to `matmul_dtype` (biases stay f32)."""
    H = raw["lstm"][0]["w_hh"].shape[1]
    perm = jnp.concatenate([jnp.arange(0, 2 * H),
                            jnp.arange(3 * H, 4 * H),
                            jnp.arange(2 * H, 3 * H)])
    packed = {"lstm": [], "fc": {}}
    for p in raw["lstm"]:
        packed["lstm"].append({
            "w_ih_t": p["w_ih"].T[:, perm].astype(matmul_dtype),
            "w_hh_t": p["w_hh"].T[:, perm].astype(matmul_dtype),
            "b": (p["b_ih"] + p["b_hh"])[perm].reshape(1, -1).astype(jnp.float32),
        })
    packed["fc"] = {"w_t": raw["fc"]["w"].T.astype(matmul_dtype),
                    "b": raw["fc"]["b"].reshape(1, -1).astype(jnp.float32)}
    return packed


# ----------------------------------------------------------------------------
# Pure-JAX reference (same math as torch.nn.LSTM + Linear) for verification
# ----------------------------------------------------------------------------
def reference_forward(x, raw, num_layers, hidden_size):
    hp = lax.Precision.HIGHEST
    H = hidden_size
    seq = x.astype(jnp.float32)                      # (B, S, Din), batch-first
    B, S, _ = seq.shape
    for l in range(num_layers):
        p = raw["lstm"][l]
        w_ih_t, w_hh_t = p["w_ih"].T, p["w_hh"].T
        b = p["b_ih"] + p["b_hh"]
        h = jnp.zeros((B, H), jnp.float32)
        c = jnp.zeros((B, H), jnp.float32)
        outs = []
        for t in range(S):
            gates = (jnp.dot(seq[:, t, :], w_ih_t, precision=hp)
                     + jnp.dot(h, w_hh_t, precision=hp) + b)
            i = jax.nn.sigmoid(gates[:, 0 * H:1 * H])
            f = jax.nn.sigmoid(gates[:, 1 * H:2 * H])
            g = jnp.tanh(gates[:, 2 * H:3 * H])
            o = jax.nn.sigmoid(gates[:, 3 * H:4 * H])
            c = f * c + i * g
            h = o * jnp.tanh(c)
            outs.append(h)
        seq = jnp.stack(outs, axis=1)                # (B, S, H)
    return jnp.dot(seq[:, -1, :], raw["fc"]["w"].T, precision=hp) + raw["fc"]["b"]


# ----------------------------------------------------------------------------
if __name__ == "__main__":
    batch, seq_len = 2, 8
    input_size, hidden_size, num_layers, num_classes = 16, 32, 2, 5

    key = jax.random.PRNGKey(0)
    key, xkey = jax.random.split(key)
    x = jax.random.normal(xkey, (batch, seq_len, input_size), jnp.float32)

    raw = init_params(key, input_size, hidden_size, num_layers, num_classes)
    ref = reference_forward(x, raw, num_layers, hidden_size)

    common = dict(num_layers=num_layers, hidden_size=hidden_size,
                  num_classes=num_classes)

    # f32 operand path (tolerance covers MXU pass-count differences between the
    # Mosaic kernel and the XLA reference matmuls).
    out_f32 = lstm_model_forward(x, pack_params(raw, jnp.float32), **common)
    out_f32 = jax.block_until_ready(out_f32)
    assert out_f32.shape == (batch, num_classes)
    assert jnp.allclose(out_f32, ref, rtol=2e-2, atol=2e-2), (
        float(jnp.max(jnp.abs(out_f32 - ref))))

    # bf16 matmul-operand path (production default per the perf review);
    # elementwise gate/cell math is still f32, so only operand rounding differs.
    out_bf16 = lstm_model_forward(x, pack_params(raw, jnp.bfloat16), **common)
    out_bf16 = jax.block_until_ready(out_bf16)
    assert out_bf16.shape == (batch, num_classes)
    assert jnp.allclose(out_bf16, ref, rtol=6e-2, atol=6e-2), (
        float(jnp.max(jnp.abs(out_bf16 - ref))))

    print("KERNEL_OK")
</pallas_src>

<mosaic_0001>
module attributes {stable_mosaic.version = 11 : i64} {
  func.func @fused_lstm_fc_kernel(%arg0: i32, %arg1: memref<8x2x16xf32, #tpu.memory_space<vmem>>, %arg2: memref<16x128xf32, #tpu.memory_space<vmem>>, %arg3: memref<32x128xf32, #tpu.memory_space<vmem>>, %arg4: memref<1x128xf32, #tpu.memory_space<vmem>>, %arg5: memref<32x128xf32, #tpu.memory_space<vmem>>, %arg6: memref<32x128xf32, #tpu.memory_space<vmem>>, %arg7: memref<1x128xf32, #tpu.memory_space<vmem>>, %arg8: memref<32x5xf32, #tpu.memory_space<vmem>>, %arg9: memref<1x5xf32, #tpu.memory_space<vmem>>, %arg10: memref<2x5xf32, #tpu.memory_space<vmem>>, %arg11: memref<8x2x128xf32, #tpu.memory_space<vmem>>, %arg12: memref<8x2x32xf32, #tpu.memory_space<vmem>>) attributes {dimension_semantics = [#tpu.dimension_semantics<parallel>], iteration_bounds = array<i64: 1>, scalar_prefetch = 0 : i64, scratch_operands = 2 : i64, tpu.core_type = #tpu.core_type<tc>, window_params = [{transform_indices = @transform_0, window_bounds = array<i64: 8, 2, 16>}, {pipeline_mode = #tpu.pipeline_mode<synchronous>, transform_indices = @transform_1, window_bounds = array<i64: 16, 128>}, {pipeline_mode = #tpu.pipeline_mode<synchronous>, transform_indices = @transform_2, window_bounds = array<i64: 32, 128>}, {pipeline_mode = #tpu.pipeline_mode<synchronous>, transform_indices = @transform_3, window_bounds = array<i64: 1, 128>}, {pipeline_mode = #tpu.pipeline_mode<synchronous>, transform_indices = @transform_4, window_bounds = array<i64: 32, 128>}, {pipeline_mode = #tpu.pipeline_mode<synchronous>, transform_indices = @transform_5, window_bounds = array<i64: 32, 128>}, {pipeline_mode = #tpu.pipeline_mode<synchronous>, transform_indices = @transform_6, window_bounds = array<i64: 1, 128>}, {pipeline_mode = #tpu.pipeline_mode<synchronous>, transform_indices = @transform_7, window_bounds = array<i64: 32, 5>}, {pipeline_mode = #tpu.pipeline_mode<synchronous>, transform_indices = @transform_8, window_bounds = array<i64: 1, 5>}, {transform_indices = @transform_9, window_bounds = array<i64: 2, 5>}]} {
    %cst = arith.constant 0.000000e+00 : f32
    %0 = vector.broadcast %cst : f32 to vector<2x32xf32>
    %cst_0 = arith.constant 0.000000e+00 : f32
    %1 = vector.broadcast %cst_0 : f32 to vector<2x32xf32>
    %c0 = arith.constant 0 : index
    %c0_1 = arith.constant 0 : index
    %c0_2 = arith.constant 0 : index
    %2 = vector.load %arg1[%c0, %c0_1, %c0_2] : memref<8x2x16xf32, #tpu.memory_space<vmem>>, vector<8x2x16xf32>
    %3 = vector.shape_cast %2 : vector<8x2x16xf32> to vector<16x16xf32>
    %c0_3 = arith.constant 0 : index
    %c0_4 = arith.constant 0 : index
    %4 = vector.load %arg2[%c0_3, %c0_4] : memref<16x128xf32, #tpu.memory_space<vmem>>, vector<16x128xf32>
    %cst_5 = arith.constant dense<0.000000e+00> : vector<16x128xf32>
    %5 = tpu.matmul %3, %4, %cst_5 {dimension_numbers = #tpu.dot_dimension_numbers<[1], [0], [0], [1], [0, 0, 1, 1], [], []>} : vector<16x16xf32>, vector<16x128xf32>, vector<16x128xf32> -> vector<16x128xf32>
    %c0_6 = arith.constant 0 : index
    %c0_7 = arith.constant 0 : index
    %6 = vector.load %arg4[%c0_6, %c0_7] : memref<1x128xf32, #tpu.memory_space<vmem>>, vector<1x128xf32>
    %7 = vector.broadcast %6 : vector<1x128xf32> to vector<16x128xf32>
    %8 = arith.addf %5, %7 : vector<16x128xf32>
    %9 = vector.shape_cast %8 : vector<16x128xf32> to vector<8x2x128xf32>
    %c0_8 = arith.constant 0 : index
    %c0_9 = arith.constant 0 : index
    %c0_10 = arith.constant 0 : index
    %10 = vector.load %arg11[%c0_8, %c0_9, %c0_10] : memref<8x2x128xf32, #tpu.memory_space<vmem>>, vector<8x2x128xf32>
    tpu.vector_store %arg11[%c0_8, %c0_9, %c0_10], %9 {strides = array<i32>} : memref<8x2x128xf32, #tpu.memory_space<vmem>>, vector<8x2x128xf32>,
    %c0_i32 = arith.constant 0 : i32
    %11 = arith.index_cast %c0_i32 : i32 to index
    %c0_11 = arith.constant 0 : index
    %c0_12 = arith.constant 0 : index
    %12 = vector.load %arg11[%11, %c0_11, %c0_12] : memref<8x2x128xf32, #tpu.memory_space<vmem>>, vector<1x2x128xf32>
    %13 = vector.shape_cast %12 : vector<1x2x128xf32> to vector<2x128xf32>
    %c0_13 = arith.constant 0 : index
    %c0_14 = arith.constant 0 : index
    %14 = vector.load %arg3[%c0_13, %c0_14] : memref<32x128xf32, #tpu.memory_space<vmem>>, vector<32x128xf32>
    %cst_15 = arith.constant dense<0.000000e+00> : vector<2x128xf32>
    %15 = tpu.matmul %0, %14, %cst_15 {dimension_numbers = #tpu.dot_dimension_numbers<[1], [0], [0], [1], [0, 0, 1, 1], [], []>} : vector<2x32xf32>, vector<32x128xf32>, vector<2x128xf32> -> vector<2x128xf32>
    %16 = arith.addf %13, %15 : vector<2x128xf32>
    %17 = vector.extract_strided_slice %16 {offsets = [0, 0], sizes = [2, 96], strides = [1, 1]} : vector<2x128xf32> to vector<2x96xf32>
    %18 = arith.negf %17 : vector<2x96xf32>
    %19 = math.exp %18 : vector<2x96xf32>
    %cst_16 = arith.constant 1.000000e+00 : f32
    %20 = vector.broadcast %cst_16 : f32 to vector<2x96xf32>
    %21 = arith.addf %20, %19 : vector<2x96xf32>
    %22 = arith.divf %20, %21 : vector<2x96xf32>
    %23 = vector.extract_strided_slice %16 {offsets = [0, 96], sizes = [2, 32], strides = [1, 1]} : vector<2x128xf32> to vector<2x32xf32>
    %24 = math.tanh %23 : vector<2x32xf32>
    %25 = vector.extract_strided_slice %22 {offsets = [0, 32], sizes = [2, 32], strides = [1, 1]} : vector<2x96xf32> to vector<2x32xf32>
    %26 = arith.mulf %25, %1 : vector<2x32xf32>
    %27 = vector.extract_strided_slice %22 {offsets = [0, 0], sizes = [2, 32], strides = [1, 1]} : vector<2x96xf32> to vector<2x32xf32>
    %28 = arith.mulf %27, %24 : vector<2x32xf32>
    %29 = arith.addf %26, %28 : vector<2x32xf32>
    %30 = vector.extract_strided_slice %22 {offsets = [0, 64], sizes = [2, 32], strides = [1, 1]} : vector<2x96xf32> to vector<2x32xf32>
    %31 = math.tanh %29 : vector<2x32xf32>
    %32 = arith.mulf %30, %31 : vector<2x32xf32>
    %c0_i32_17 = arith.constant 0 : i32
    %33 = arith.addi %c0_i32_17, %c0_i32 : i32
    %34 = arith.index_cast %33 : i32 to index
    %c0_18 = arith.constant 0 : index
    %c0_19 = arith.constant 0 : index
    %35 = vector.load %arg12[%34, %c0_18, %c0_19] : memref<8x2x32xf32, #tpu.memory_space<vmem>>, vector<1x2x32xf32>
    %36 = vector.shape_cast %35 : vector<1x2x32xf32> to vector<2x32xf32>
    %37 = vector.shape_cast %32 : vector<2x32xf32> to vector<1x2x32xf32>
    tpu.vector_store %arg12[%34, %c0_18, %c0_19], %37 {strides = array<i32>} : memref<8x2x32xf32, #tpu.memory_space<vmem>>, vector<1x2x32xf32>,
    %c1_i32 = arith.constant 1 : i32
    %38 = arith.index_cast %c1_i32 : i32 to index
    %c0_20 = arith.constant 0 : index
    %c0_21 = arith.constant 0 : index
    %39 = vector.load %arg11[%38, %c0_20, %c0_21] : memref<8x2x128xf32, #tpu.memory_space<vmem>>, vector<1x2x128xf32>
    %40 = vector.shape_cast %39 : vector<1x2x128xf32> to vector<2x128xf32>
    %c0_22 = arith.constant 0 : index
    %c0_23 = arith.constant 0 : index
    %41 = vector.load %arg3[%c0_22, %c0_23] : memref<32x128xf32, #tpu.memory_space<vmem>>, vector<32x128xf32>
    %cst_24 = arith.constant dense<0.000000e+00> : vector<2x128xf32>
    %42 = tpu.matmul %32, %41, %cst_24 {dimension_numbers = #tpu.dot_dimension_numbers<[1], [0], [0], [1], [0, 0, 1, 1], [], []>} : vector<2x32xf32>, vector<32x128xf32>, vector<2x128xf32> -> vector<2x128xf32>
    %43 = arith.addf %40, %42 : vector<2x128xf32>
    %44 = vector.extract_strided_slice %43 {offsets = [0, 0], sizes = [2, 96], strides = [1, 1]} : vector<2x128xf32> to vector<2x96xf32>
    %45 = arith.negf %44 : vector<2x96xf32>
    %46 = math.exp %45 : vector<2x96xf32>
    %cst_25 = arith.constant 1.000000e+00 : f32
    %47 = vector.broadcast %cst_25 : f32 to vector<2x96xf32>
    %48 = arith.addf %47, %46 : vector<2x96xf32>
    %49 = arith.divf %47, %48 : vector<2x96xf32>
    %50 = vector.extract_strided_slice %43 {offsets = [0, 96], sizes = [2, 32], strides = [1, 1]} : vector<2x128xf32> to vector<2x32xf32>
    %51 = math.tanh %50 : vector<2x32xf32>
    %52 = vector.extract_strided_slice %49 {offsets = [0, 32], sizes = [2, 32], strides = [1, 1]} : vector<2x96xf32> to vector<2x32xf32>
    %53 = arith.mulf %52, %29 : vector<2x32xf32>
    %54 = vector.extract_strided_slice %49 {offsets = [0, 0], sizes = [2, 32], strides = [1, 1]} : vector<2x96xf32> to vector<2x32xf32>
    %55 = arith.mulf %54, %51 : vector<2x32xf32>
    %56 = arith.addf %53, %55 : vector<2x32xf32>
    %57 = vector.extract_strided_slice %49 {offsets = [0, 64], sizes = [2, 32], strides = [1, 1]} : vector<2x96xf32> to vector<2x32xf32>
    %58 = math.tanh %56 : vector<2x32xf32>
    %59 = arith.mulf %57, %58 : vector<2x32xf32>
    %c0_i32_26 = arith.constant 0 : i32
    %60 = arith.addi %c0_i32_26, %c1_i32 : i32
    %61 = arith.index_cast %60 : i32 to index
    %c0_27 = arith.constant 0 : index
    %c0_28 = arith.constant 0 : index
    %62 = vector.load %arg12[%61, %c0_27, %c0_28] : memref<8x2x32xf32, #tpu.memory_space<vmem>>, vector<1x2x32xf32>
    %63 = vector.shape_cast %62 : vector<1x2x32xf32> to vector<2x32xf32>
    %64 = vector.shape_cast %59 : vector<2x32xf32> to vector<1x2x32xf32>
    tpu.vector_store %arg12[%61, %c0_27, %c0_28], %64 {strides = array<i32>} : memref<8x2x32xf32, #tpu.memory_space<vmem>>, vector<1x2x32xf32>,
    %c2_i32 = arith.constant 2 : i32
    %65 = arith.index_cast %c2_i32 : i32 to index
    %c0_29 = arith.constant 0 : index
    %c0_30 = arith.constant 0 : index
    %66 = vector.load %arg11[%65, %c0_29, %c0_30] : memref<8x2x128xf32, #tpu.memory_space<vmem>>, vector<1x2x128xf32>
    %67 = vector.shape_cast %66 : vector<1x2x128xf32> to vector<2x128xf32>
    %c0_31 = arith.constant 0 : index
    %c0_32 = arith.constant 0 : index
    %68 = vector.load %arg3[%c0_31, %c0_32] : memref<32x128xf32, #tpu.memory_space<vmem>>, vector<32x128xf32>
    %cst_33 = arith.constant dense<0.000000e+00> : vector<2x128xf32>
    %69 = tpu.matmul %59, %68, %cst_33 {dimension_numbers = #tpu.dot_dimension_numbers<[1], [0], [0], [1], [0, 0, 1, 1], [], []>} : vector<2x32xf32>, vector<32x128xf32>, vector<2x128xf32> -> vector<2x128xf32>
    %70 = arith.addf %67, %69 : vector<2x128xf32>
    %71 = vector.extract_strided_slice %70 {offsets = [0, 0], sizes = [2, 96], strides = [1, 1]} : vector<2x128xf32> to vector<2x96xf32>
    %72 = arith.negf %71 : vector<2x96xf32>
    %73 = math.exp %72 : vector<2x96xf32>
    %cst_34 = arith.constant 1.000000e+00 : f32
    %74 = vector.broadcast %cst_34 : f32 to vector<2x96xf32>
    %75 = arith.addf %74, %73 : vector<2x96xf32>
    %76 = arith.divf %74, %75 : vector<2x96xf32>
    %77 = vector.extract_strided_slice %70 {offsets = [0, 96], sizes = [2, 32], strides = [1, 1]} : vector<2x128xf32> to vector<2x32xf32>
    %78 = math.tanh %77 : vector<2x32xf32>
    %79 = vector.extract_strided_slice %76 {offsets = [0, 32], sizes = [2, 32], strides = [1, 1]} : vector<2x96xf32> to vector<2x32xf32>
    %80 = arith.mulf %79, %56 : vector<2x32xf32>
    %81 = vector.extract_strided_slice %76 {offsets = [0, 0], sizes = [2, 32], strides = [1, 1]} : vector<2x96xf32> to vector<2x32xf32>
    %82 = arith.mulf %81, %78 : vector<2x32xf32>
    %83 = arith.addf %80, %82 : vector<2x32xf32>
    %84 = vector.extract_strided_slice %76 {offsets = [0, 64], sizes = [2, 32], strides = [1, 1]} : vector<2x96xf32> to vector<2x32xf32>
    %85 = math.tanh %83 : vector<2x32xf32>
    %86 = arith.mulf %84, %85 : vector<2x32xf32>
    %c0_i32_35 = arith.constant 0 : i32
    %87 = arith.addi %c0_i32_35, %c2_i32 : i32
    %88 = arith.index_cast %87 : i32 to index
    %c0_36 = arith.constant 0 : index
    %c0_37 = arith.constant 0 : index
    %89 = vector.load %arg12[%88, %c0_36, %c0_37] : memref<8x2x32xf32, #tpu.memory_space<vmem>>, vector<1x2x32xf32>
    %90 = vector.shape_cast %89 : vector<1x2x32xf32> to vector<2x32xf32>
    %91 = vector.shape_cast %86 : vector<2x32xf32> to vector<1x2x32xf32>
    tpu.vector_store %arg12[%88, %c0_36, %c0_37], %91 {strides = array<i32>} : memref<8x2x32xf32, #tpu.memory_space<vmem>>, vector<1x2x32xf32>,
    %c3_i32 = arith.constant 3 : i32
    %92 = arith.index_cast %c3_i32 : i32 to index
    %c0_38 = arith.constant 0 : index
    %c0_39 = arith.constant 0 : index
    %93 = vector.load %arg11[%92, %c0_38, %c0_39] : memref<8x2x128xf32, #tpu.memory_space<vmem>>, vector<1x2x128xf32>
    %94 = vector.shape_cast %93 : vector<1x2x128xf32> to vector<2x128xf32>
    %c0_40 = arith.constant 0 : index
    %c0_41 = arith.constant 0 : index
    %95 = vector.load %arg3[%c0_40, %c0_41] : memref<32x128xf32, #tpu.memory_space<vmem>>, vector<32x128xf32>
    %cst_42 = arith.constant dense<0.000000e+00> : vector<2x128xf32>
    %96 = tpu.matmul %86, %95, %cst_42 {dimension_numbers = #tpu.dot_dimension_numbers<[1], [0], [0], [1], [0, 0, 1, 1], [], []>} : vector<2x32xf32>, vector<32x128xf32>, vector<2x128xf32> -> vector<2x128xf32>
    %97 = arith.addf %94, %96 : vector<2x128xf32>
    %98 = vector.extract_strided_slice %97 {offsets = [0, 0], sizes = [2, 96], strides = [1, 1]} : vector<2x128xf32> to vector<2x96xf32>
    %99 = arith.negf %98 : vector<2x96xf32>
    %100 = math.exp %99 : vector<2x96xf32>
    %cst_43 = arith.constant 1.000000e+00 : f32
    %101 = vector.broadcast %cst_43 : f32 to vector<2x96xf32>
    %102 = arith.addf %101, %100 : vector<2x96xf32>
    %103 = arith.divf %101, %102 : vector<2x96xf32>
    %104 = vector.extract_strided_slice %97 {offsets = [0, 96], sizes = [2, 32], strides = [1, 1]} : vector<2x128xf32> to vector<2x32xf32>
    %105 = math.tanh %104 : vector<2x32xf32>
    %106 = vector.extract_strided_slice %103 {offsets = [0, 32], sizes = [2, 32], strides = [1, 1]} : vector<2x96xf32> to vector<2x32xf32>
    %107 = arith.mulf %106, %83 : vector<2x32xf32>
    %108 = vector.extract_strided_slice %103 {offsets = [0, 0], sizes = [2, 32], strides = [1, 1]} : vector<2x96xf32> to vector<2x32xf32>
    %109 = arith.mulf %108, %105 : vector<2x32xf32>
    %110 = arith.addf %107, %109 : vector<2x32xf32>
    %111 = vector.extract_strided_slice %103 {offsets = [0, 64], sizes = [2, 32], strides = [1, 1]} : vector<2x96xf32> to vector<2x32xf32>
    %112 = math.tanh %110 : vector<2x32xf32>
    %113 = arith.mulf %111, %112 : vector<2x32xf32>
    %c0_i32_44 = arith.constant 0 : i32
    %114 = arith.addi %c0_i32_44, %c3_i32 : i32
    %115 = arith.index_cast %114 : i32 to index
    %c0_45 = arith.constant 0 : index
    %c0_46 = arith.constant 0 : index
    %116 = vector.load %arg12[%115, %c0_45, %c0_46] : memref<8x2x32xf32, #tpu.memory_space<vmem>>, vector<1x2x32xf32>
    %117 = vector.shape_cast %116 : vector<1x2x32xf32> to vector<2x32xf32>
    %118 = vector.shape_cast %113 : vector<2x32xf32> to vector<1x2x32xf32>
    tpu.vector_store %arg12[%115, %c0_45, %c0_46], %118 {strides = array<i32>} : memref<8x2x32xf32, #tpu.memory_space<vmem>>, vector<1x2x32xf32>,
    %c4_i32 = arith.constant 4 : i32
    %119 = arith.index_cast %c4_i32 : i32 to index
    %c0_47 = arith.constant 0 : index
    %c0_48 = arith.constant 0 : index
    %120 = vector.load %arg11[%119, %c0_47, %c0_48] : memref<8x2x128xf32, #tpu.memory_space<vmem>>, vector<1x2x128xf32>
    %121 = vector.shape_cast %120 : vector<1x2x128xf32> to vector<2x128xf32>
    %c0_49 = arith.constant 0 : index
    %c0_50 = arith.constant 0 : index
    %122 = vector.load %arg3[%c0_49, %c0_50] : memref<32x128xf32, #tpu.memory_space<vmem>>, vector<32x128xf32>
    %cst_51 = arith.constant dense<0.000000e+00> : vector<2x128xf32>
    %123 = tpu.matmul %113, %122, %cst_51 {dimension_numbers = #tpu.dot_dimension_numbers<[1], [0], [0], [1], [0, 0, 1, 1], [], []>} : vector<2x32xf32>, vector<32x128xf32>, vector<2x128xf32> -> vector<2x128xf32>
    %124 = arith.addf %121, %123 : vector<2x128xf32>
    %125 = vector.extract_strided_slice %124 {offsets = [0, 0], sizes = [2, 96], strides = [1, 1]} : vector<2x128xf32> to vector<2x96xf32>
    %126 = arith.negf %125 : vector<2x96xf32>
    %127 = math.exp %126 : vector<2x96xf32>
    %cst_52 = arith.constant 1.000000e+00 : f32
    %128 = vector.broadcast %cst_52 : f32 to vector<2x96xf32>
    %129 = arith.addf %128, %127 : vector<2x96xf32>
    %130 = arith.divf %128, %129 : vector<2x96xf32>
    %131 = vector.extract_strided_slice %124 {offsets = [0, 96], sizes = [2, 32], strides = [1, 1]} : vector<2x128xf32> to vector<2x32xf32>
    %132 = math.tanh %131 : vector<2x32xf32>
    %133 = vector.extract_strided_slice %130 {offsets = [0, 32], sizes = [2, 32], strides = [1, 1]} : vector<2x96xf32> to vector<2x32xf32>
    %134 = arith.mulf %133, %110 : vector<2x32xf32>
    %135 = vector.extract_strided_slice %130 {offsets = [0, 0], sizes = [2, 32], strides = [1, 1]} : vector<2x96xf32> to vector<2x32xf32>
    %136 = arith.mulf %135, %132 : vector<2x32xf32>
    %137 = arith.addf %134, %136 : vector<2x32xf32>
    %138 = vector.extract_strided_slice %130 {offsets = [0, 64], sizes = [2, 32], strides = [1, 1]} : vector<2x96xf32> to vector<2x32xf32>
    %139 = math.tanh %137 : vector<2x32xf32>
    %140 = arith.mulf %138, %139 : vector<2x32xf32>
    %c0_i32_53 = arith.constant 0 : i32
    %141 = arith.addi %c0_i32_53, %c4_i32 : i32
    %142 = arith.index_cast %141 : i32 to index
    %c0_54 = arith.constant 0 : index
    %c0_55 = arith.constant 0 : index
    %143 = vector.load %arg12[%142, %c0_54, %c0_55] : memref<8x2x32xf32, #tpu.memory_space<vmem>>, vector<1x2x32xf32>
    %144 = vector.shape_cast %143 : vector<1x2x32xf32> to vector<2x32xf32>
    %145 = vector.shape_cast %140 : vector<2x32xf32> to vector<1x2x32xf32>
    tpu.vector_store %arg12[%142, %c0_54, %c0_55], %145 {strides = array<i32>} : memref<8x2x32xf32, #tpu.memory_space<vmem>>, vector<1x2x32xf32>,
    %c5_i32 = arith.constant 5 : i32
    %146 = arith.index_cast %c5_i32 : i32 to index
    %c0_56 = arith.constant 0 : index
    %c0_57 = arith.constant 0 : index
    %147 = vector.load %arg11[%146, %c0_56, %c0_57] : memref<8x2x128xf32, #tpu.memory_space<vmem>>, vector<1x2x128xf32>
    %148 = vector.shape_cast %147 : vector<1x2x128xf32> to vector<2x128xf32>
    %c0_58 = arith.constant 0 : index
    %c0_59 = arith.constant 0 : index
    %149 = vector.load %arg3[%c0_58, %c0_59] : memref<32x128xf32, #tpu.memory_space<vmem>>, vector<32x128xf32>
    %cst_60 = arith.constant dense<0.000000e+00> : vector<2x128xf32>
    %150 = tpu.matmul %140, %149, %cst_60 {dimension_numbers = #tpu.dot_dimension_numbers<[1], [0], [0], [1], [0, 0, 1, 1], [], []>} : vector<2x32xf32>, vector<32x128xf32>, vector<2x128xf32> -> vector<2x128xf32>
    %151 = arith.addf %148, %150 : vector<2x128xf32>
    %152 = vector.extract_strided_slice %151 {offsets = [0, 0], sizes = [2, 96], strides = [1, 1]} : vector<2x128xf32> to vector<2x96xf32>
    %153 = arith.negf %152 : vector<2x96xf32>
    %154 = math.exp %153 : vector<2x96xf32>
    %cst_61 = arith.constant 1.000000e+00 : f32
    %155 = vector.broadcast %cst_61 : f32 to vector<2x96xf32>
    %156 = arith.addf %155, %154 : vector<2x96xf32>
    %157 = arith.divf %155, %156 : vector<2x96xf32>
    %158 = vector.extract_strided_slice %151 {offsets = [0, 96], sizes = [2, 32], strides = [1, 1]} : vector<2x128xf32> to vector<2x32xf32>
    %159 = math.tanh %158 : vector<2x32xf32>
    %160 = vector.extract_strided_slice %157 {offsets = [0, 32], sizes = [2, 32], strides = [1, 1]} : vector<2x96xf32> to vector<2x32xf32>
    %161 = arith.mulf %160, %137 : vector<2x32xf32>
    %162 = vector.extract_strided_slice %157 {offsets = [0, 0], sizes = [2, 32], strides = [1, 1]} : vector<2x96xf32> to vector<2x32xf32>
    %163 = arith.mulf %162, %159 : vector<2x32xf32>
    %164 = arith.addf %161, %163 : vector<2x32xf32>
    %165 = vector.extract_strided_slice %157 {offsets = [0, 64], sizes = [2, 32], strides = [1, 1]} : vector<2x96xf32> to vector<2x32xf32>
    %166 = math.tanh %164 : vector<2x32xf32>
    %167 = arith.mulf %165, %166 : vector<2x32xf32>
    %c0_i32_62 = arith.constant 0 : i32
    %168 = arith.addi %c0_i32_62, %c5_i32 : i32
    %169 = arith.index_cast %168 : i32 to index
    %c0_63 = arith.constant 0 : index
    %c0_64 = arith.constant 0 : index
    %170 = vector.load %arg12[%169, %c0_63, %c0_64] : memref<8x2x32xf32, #tpu.memory_space<vmem>>, vector<1x2x32xf32>
    %171 = vector.shape_cast %170 : vector<1x2x32xf32> to vector<2x32xf32>
    %172 = vector.shape_cast %167 : vector<2x32xf32> to vector<1x2x32xf32>
    tpu.vector_store %arg12[%169, %c0_63, %c0_64], %172 {strides = array<i32>} : memref<8x2x32xf32, #tpu.memory_space<vmem>>, vector<1x2x32xf32>,
    %c6_i32 = arith.constant 6 : i32
    %173 = arith.index_cast %c6_i32 : i32 to index
    %c0_65 = arith.constant 0 : index
    %c0_66 = arith.constant 0 : index
    %174 = vector.load %arg11[%173, %c0_65, %c0_66] : memref<8x2x128xf32, #tpu.memory_space<vmem>>, vector<1x2x128xf32>
    %175 = vector.shape_cast %174 : vector<1x2x128xf32> to vector<2x128xf32>
    %c0_67 = arith.constant 0 : index
    %c0_68 = arith.constant 0 : index
    %176 = vector.load %arg3[%c0_67, %c0_68] : memref<32x128xf32, #tpu.memory_space<vmem>>, vector<32x128xf32>
    %cst_69 = arith.constant dense<0.000000e+00> : vector<2x128xf32>
    %177 = tpu.matmul %167, %176, %cst_69 {dimension_numbers = #tpu.dot_dimension_numbers<[1], [0], [0], [1], [0, 0, 1, 1], [], []>} : vector<2x32xf32>, vector<32x128xf32>, vector<2x128xf32> -> vector<2x128xf32>
    %178 = arith.addf %175, %177 : vector<2x128xf32>
    %179 = vector.extract_strided_slice %178 {offsets = [0, 0], sizes = [2, 96], strides = [1, 1]} : vector<2x128xf32> to vector<2x96xf32>
    %180 = arith.negf %179 : vector<2x96xf32>
    %181 = math.exp %180 : vector<2x96xf32>
    %cst_70 = arith.constant 1.000000e+00 : f32
    %182 = vector.broadcast %cst_70 : f32 to vector<2x96xf32>
    %183 = arith.addf %182, %181 : vector<2x96xf32>
    %184 = arith.divf %182, %183 : vector<2x96xf32>
    %185 = vector.extract_strided_slice %178 {offsets = [0, 96], sizes = [2, 32], strides = [1, 1]} : vector<2x128xf32> to vector<2x32xf32>
    %186 = math.tanh %185 : vector<2x32xf32>
    %187 = vector.extract_strided_slice %184 {offsets = [0, 32], sizes = [2, 32], strides = [1, 1]} : vector<2x96xf32> to vector<2x32xf32>
    %188 = arith.mulf %187, %164 : vector<2x32xf32>
    %189 = vector.extract_strided_slice %184 {offsets = [0, 0], sizes = [2, 32], strides = [1, 1]} : vector<2x96xf32> to vector<2x32xf32>
    %190 = arith.mulf %189, %186 : vector<2x32xf32>
    %191 = arith.addf %188, %190 : vector<2x32xf32>
    %192 = vector.extract_strided_slice %184 {offsets = [0, 64], sizes = [2, 32], strides = [1, 1]} : vector<2x96xf32> to vector<2x32xf32>
    %193 = math.tanh %191 : vector<2x32xf32>
    %194 = arith.mulf %192, %193 : vector<2x32xf32>
    %c0_i32_71 = arith.constant 0 : i32
    %195 = arith.addi %c0_i32_71, %c6_i32 : i32
    %196 = arith.index_cast %195 : i32 to index
    %c0_72 = arith.constant 0 : index
    %c0_73 = arith.constant 0 : index
    %197 = vector.load %arg12[%196, %c0_72, %c0_73] : memref<8x2x32xf32, #tpu.memory_space<vmem>>, vector<1x2x32xf32>
    %198 = vector.shape_cast %197 : vector<1x2x32xf32> to vector<2x32xf32>
    %199 = vector.shape_cast %194 : vector<2x32xf32> to vector<1x2x32xf32>
    tpu.vector_store %arg12[%196, %c0_72, %c0_73], %199 {strides = array<i32>} : memref<8x2x32xf32, #tpu.memory_space<vmem>>, vector<1x2x32xf32>,
    %c7_i32 = arith.constant 7 : i32
    %200 = arith.index_cast %c7_i32 : i32 to index
    %c0_74 = arith.constant 0 : index
    %c0_75 = arith.constant 0 : index
    %201 = vector.load %arg11[%200, %c0_74, %c0_75] : memref<8x2x128xf32, #tpu.memory_space<vmem>>, vector<1x2x128xf32>
    %202 = vector.shape_cast %201 : vector<1x2x128xf32> to vector<2x128xf32>
    %c0_76 = arith.constant 0 : index
    %c0_77 = arith.constant 0 : index
    %203 = vector.load %arg3[%c0_76, %c0_77] : memref<32x128xf32, #tpu.memory_space<vmem>>, vector<32x128xf32>
    %cst_78 = arith.constant dense<0.000000e+00> : vector<2x128xf32>
    %204 = tpu.matmul %194, %203, %cst_78 {dimension_numbers = #tpu.dot_dimension_numbers<[1], [0], [0], [1], [0, 0, 1, 1], [], []>} : vector<2x32xf32>, vector<32x128xf32>, vector<2x128xf32> -> vector<2x128xf32>
    %205 = arith.addf %202, %204 : vector<2x128xf32>
    %206 = vector.extract_strided_slice %205 {offsets = [0, 0], sizes = [2, 96], strides = [1, 1]} : vector<2x128xf32> to vector<2x96xf32>
    %207 = arith.negf %206 : vector<2x96xf32>
    %208 = math.exp %207 : vector<2x96xf32>
    %cst_79 = arith.constant 1.000000e+00 : f32
    %209 = vector.broadcast %cst_79 : f32 to vector<2x96xf32>
    %210 = arith.addf %209, %208 : vector<2x96xf32>
    %211 = arith.divf %209, %210 : vector<2x96xf32>
    %212 = vector.extract_strided_slice %205 {offsets = [0, 96], sizes = [2, 32], strides = [1, 1]} : vector<2x128xf32> to vector<2x32xf32>
    %213 = math.tanh %212 : vector<2x32xf32>
    %214 = vector.extract_strided_slice %211 {offsets = [0, 32], sizes = [2, 32], strides = [1, 1]} : vector<2x96xf32> to vector<2x32xf32>
    %215 = arith.mulf %214, %191 : vector<2x32xf32>
    %216 = vector.extract_strided_slice %211 {offsets = [0, 0], sizes = [2, 32], strides = [1, 1]} : vector<2x96xf32> to vector<2x32xf32>
    %217 = arith.mulf %216, %213 : vector<2x32xf32>
    %218 = arith.addf %215, %217 : vector<2x32xf32>
    %219 = vector.extract_strided_slice %211 {offsets = [0, 64], sizes = [2, 32], strides = [1, 1]} : vector<2x96xf32> to vector<2x32xf32>
    %220 = math.tanh %218 : vector<2x32xf32>
    %221 = arith.mulf %219, %220 : vector<2x32xf32>
    %c0_i32_80 = arith.constant 0 : i32
    %222 = arith.addi %c0_i32_80, %c7_i32 : i32
    %223 = arith.index_cast %222 : i32 to index
    %c0_81 = arith.constant 0 : index
    %c0_82 = arith.constant 0 : index
    %224 = vector.load %arg12[%223, %c0_81, %c0_82] : memref<8x2x32xf32, #tpu.memory_space<vmem>>, vector<1x2x32xf32>
    %225 = vector.shape_cast %224 : vector<1x2x32xf32> to vector<2x32xf32>
    %226 = vector.shape_cast %221 : vector<2x32xf32> to vector<1x2x32xf32>
    tpu.vector_store %arg12[%223, %c0_81, %c0_82], %226 {strides = array<i32>} : memref<8x2x32xf32, #tpu.memory_space<vmem>>, vector<1x2x32xf32>,
    %c8_i32 = arith.constant 8 : i32
    %cst_83 = arith.constant 0.000000e+00 : f32
    %227 = vector.broadcast %cst_83 : f32 to vector<2x32xf32>
    %cst_84 = arith.constant 0.000000e+00 : f32
    %228 = vector.broadcast %cst_84 : f32 to vector<2x32xf32>
    %c0_85 = arith.constant 0 : index
    %c0_86 = arith.constant 0 : index
    %c0_87 = arith.constant 0 : index
    %229 = vector.load %arg12[%c0_85, %c0_86, %c0_87] : memref<8x2x32xf32, #tpu.memory_space<vmem>>, vector<8x2x32xf32>
    %230 = vector.shape_cast %229 : vector<8x2x32xf32> to vector<16x32xf32>
    %c0_88 = arith.constant 0 : index
    %c0_89 = arith.constant 0 : index
    %231 = vector.load %arg5[%c0_88, %c0_89] : memref<32x128xf32, #tpu.memory_space<vmem>>, vector<32x128xf32>
    %cst_90 = arith.constant dense<0.000000e+00> : vector<16x128xf32>
    %232 = tpu.matmul %230, %231, %cst_90 {dimension_numbers = #tpu.dot_dimension_numbers<[1], [0], [0], [1], [0, 0, 1, 1], [], []>} : vector<16x32xf32>, vector<32x128xf32>, vector<16x128xf32> -> vector<16x128xf32>
    %c0_91 = arith.constant 0 : index
    %c0_92 = arith.constant 0 : index
    %233 = vector.load %arg7[%c0_91, %c0_92] : memref<1x128xf32, #tpu.memory_space<vmem>>, vector<1x128xf32>
    %234 = vector.broadcast %233 : vector<1x128xf32> to vector<16x128xf32>
    %235 = arith.addf %232, %234 : vector<16x128xf32>
    %236 = vector.shape_cast %235 : vector<16x128xf32> to vector<8x2x128xf32>
    %c0_93 = arith.constant 0 : index
    %c0_94 = arith.constant 0 : index
    %c0_95 = arith.constant 0 : index
    %237 = vector.load %arg11[%c0_93, %c0_94, %c0_95] : memref<8x2x128xf32, #tpu.memory_space<vmem>>, vector<8x2x128xf32>
    tpu.vector_store %arg11[%c0_93, %c0_94, %c0_95], %236 {strides = array<i32>} : memref<8x2x128xf32, #tpu.memory_space<vmem>>, vector<8x2x128xf32>,
    %c0_i32_96 = arith.constant 0 : i32
    %238 = arith.index_cast %c0_i32_96 : i32 to index
    %c0_97 = arith.constant 0 : index
    %c0_98 = arith.constant 0 : index
    %239 = vector.load %arg11[%238, %c0_97, %c0_98] : memref<8x2x128xf32, #tpu.memory_space<vmem>>, vector<1x2x128xf32>
    %240 = vector.shape_cast %239 : vector<1x2x128xf32> to vector<2x128xf32>
    %c0_99 = arith.constant 0 : index
    %c0_100 = arith.constant 0 : index
    %241 = vector.load %arg6[%c0_99, %c0_100] : memref<32x128xf32, #tpu.memory_space<vmem>>, vector<32x128xf32>
    %cst_101 = arith.constant dense<0.000000e+00> : vector<2x128xf32>
    %242 = tpu.matmul %227, %241, %cst_101 {dimension_numbers = #tpu.dot_dimension_numbers<[1], [0], [0], [1], [0, 0, 1, 1], [], []>} : vector<2x32xf32>, vector<32x128xf32>, vector<2x128xf32> -> vector<2x128xf32>
    %243 = arith.addf %240, %242 : vector<2x128xf32>
    %244 = vector.extract_strided_slice %243 {offsets = [0, 0], sizes = [2, 96], strides = [1, 1]} : vector<2x128xf32> to vector<2x96xf32>
    %245 = arith.negf %244 : vector<2x96xf32>
    %246 = math.exp %245 : vector<2x96xf32>
    %cst_102 = arith.constant 1.000000e+00 : f32
    %247 = vector.broadcast %cst_102 : f32 to vector<2x96xf32>
    %248 = arith.addf %247, %246 : vector<2x96xf32>
    %249 = arith.divf %247, %248 : vector<2x96xf32>
    %250 = vector.extract_strided_slice %243 {offsets = [0, 96], sizes = [2, 32], strides = [1, 1]} : vector<2x128xf32> to vector<2x32xf32>
    %251 = math.tanh %250 : vector<2x32xf32>
    %252 = vector.extract_strided_slice %249 {offsets = [0, 32], sizes = [2, 32], strides = [1, 1]} : vector<2x96xf32> to vector<2x32xf32>
    %253 = arith.mulf %252, %228 : vector<2x32xf32>
    %254 = vector.extract_strided_slice %249 {offsets = [0, 0], sizes = [2, 32], strides = [1, 1]} : vector<2x96xf32> to vector<2x32xf32>
    %255 = arith.mulf %254, %251 : vector<2x32xf32>
    %256 = arith.addf %253, %255 : vector<2x32xf32>
    %257 = vector.extract_strided_slice %249 {offsets = [0, 64], sizes = [2, 32], strides = [1, 1]} : vector<2x96xf32> to vector<2x32xf32>
    %258 = math.tanh %256 : vector<2x32xf32>
    %259 = arith.mulf %257, %258 : vector<2x32xf32>
    %c1_i32_103 = arith.constant 1 : i32
    %260 = arith.index_cast %c1_i32_103 : i32 to index
    %c0_104 = arith.constant 0 : index
    %c0_105 = arith.constant 0 : index
    %261 = vector.load %arg11[%260, %c0_104, %c0_105] : memref<8x2x128xf32, #tpu.memory_space<vmem>>, vector<1x2x128xf32>
    %262 = vector.shape_cast %261 : vector<1x2x128xf32> to vector<2x128xf32>
    %c0_106 = arith.constant 0 : index
    %c0_107 = arith.constant 0 : index
    %263 = vector.load %arg6[%c0_106, %c0_107] : memref<32x128xf32, #tpu.memory_space<vmem>>, vector<32x128xf32>
    %cst_108 = arith.constant dense<0.000000e+00> : vector<2x128xf32>
    %264 = tpu.matmul %259, %263, %cst_108 {dimension_numbers = #tpu.dot_dimension_numbers<[1], [0], [0], [1], [0, 0, 1, 1], [], []>} : vector<2x32xf32>, vector<32x128xf32>, vector<2x128xf32> -> vector<2x128xf32>
    %265 = arith.addf %262, %264 : vector<2x128xf32>
    %266 = vector.extract_strided_slice %265 {offsets = [0, 0], sizes = [2, 96], strides = [1, 1]} : vector<2x128xf32> to vector<2x96xf32>
    %267 = arith.negf %266 : vector<2x96xf32>
    %268 = math.exp %267 : vector<2x96xf32>
    %cst_109 = arith.constant 1.000000e+00 : f32
    %269 = vector.broadcast %cst_109 : f32 to vector<2x96xf32>
    %270 = arith.addf %269, %268 : vector<2x96xf32>
    %271 = arith.divf %269, %270 : vector<2x96xf32>
    %272 = vector.extract_strided_slice %265 {offsets = [0, 96], sizes = [2, 32], strides = [1, 1]} : vector<2x128xf32> to vector<2x32xf32>
    %273 = math.tanh %272 : vector<2x32xf32>
    %274 = vector.extract_strided_slice %271 {offsets = [0, 32], sizes = [2, 32], strides = [1, 1]} : vector<2x96xf32> to vector<2x32xf32>
    %275 = arith.mulf %274, %256 : vector<2x32xf32>
    %276 = vector.extract_strided_slice %271 {offsets = [0, 0], sizes = [2, 32], strides = [1, 1]} : vector<2x96xf32> to vector<2x32xf32>
    %277 = arith.mulf %276, %273 : vector<2x32xf32>
    %278 = arith.addf %275, %277 : vector<2x32xf32>
    %279 = vector.extract_strided_slice %271 {offsets = [0, 64], sizes = [2, 32], strides = [1, 1]} : vector<2x96xf32> to vector<2x32xf32>
    %280 = math.tanh %278 : vector<2x32xf32>
    %281 = arith.mulf %279, %280 : vector<2x32xf32>
    %c2_i32_110 = arith.constant 2 : i32
    %282 = arith.index_cast %c2_i32_110 : i32 to index
    %c0_111 = arith.constant 0 : index
    %c0_112 = arith.constant 0 : index
    %283 = vector.load %arg11[%282, %c0_111, %c0_112] : memref<8x2x128xf32, #tpu.memory_space<vmem>>, vector<1x2x128xf32>
    %284 = vector.shape_cast %283 : vector<1x2x128xf32> to vector<2x128xf32>
    %c0_113 = arith.constant 0 : index
    %c0_114 = arith.constant 0 : index
    %285 = vector.load %arg6[%c0_113, %c0_114] : memref<32x128xf32, #tpu.memory_space<vmem>>, vector<32x128xf32>
    %cst_115 = arith.constant dense<0.000000e+00> : vector<2x128xf32>
    %286 = tpu.matmul %281, %285, %cst_115 {dimension_numbers = #tpu.dot_dimension_numbers<[1], [0], [0], [1], [0, 0, 1, 1], [], []>} : vector<2x32xf32>, vector<32x128xf32>, vector<2x128xf32> -> vector<2x128xf32>
    %287 = arith.addf %284, %286 : vector<2x128xf32>
    %288 = vector.extract_strided_slice %287 {offsets = [0, 0], sizes = [2, 96], strides = [1, 1]} : vector<2x128xf32> to vector<2x96xf32>
    %289 = arith.negf %288 : vector<2x96xf32>
    %290 = math.exp %289 : vector<2x96xf32>
    %cst_116 = arith.constant 1.000000e+00 : f32
    %291 = vector.broadcast %cst_116 : f32 to vector<2x96xf32>
    %292 = arith.addf %291, %290 : vector<2x96xf32>
    %293 = arith.divf %291, %292 : vector<2x96xf32>
    %294 = vector.extract_strided_slice %287 {offsets = [0, 96], sizes = [2, 32], strides = [1, 1]} : vector<2x128xf32> to vector<2x32xf32>
    %295 = math.tanh %294 : vector<2x32xf32>
    %296 = vector.extract_strided_slice %293 {offsets = [0, 32], sizes = [2, 32], strides = [1, 1]} : vector<2x96xf32> to vector<2x32xf32>
    %297 = arith.mulf %296, %278 : vector<2x32xf32>
    %298 = vector.extract_strided_slice %293 {offsets = [0, 0], sizes = [2, 32], strides = [1, 1]} : vector<2x96xf32> to vector<2x32xf32>
    %299 = arith.mulf %298, %295 : vector<2x32xf32>
    %300 = arith.addf %297, %299 : vector<2x32xf32>
    %301 = vector.extract_strided_slice %293 {offsets = [0, 64], sizes = [2, 32], strides = [1, 1]} : vector<2x96xf32> to vector<2x32xf32>
    %302 = math.tanh %300 : vector<2x32xf32>
    %303 = arith.mulf %301, %302 : vector<2x32xf32>
    %c3_i32_117 = arith.constant 3 : i32
    %304 = arith.index_cast %c3_i32_117 : i32 to index
    %c0_118 = arith.constant 0 : index
    %c0_119 = arith.constant 0 : index
    %305 = vector.load %arg11[%304, %c0_118, %c0_119] : memref<8x2x128xf32, #tpu.memory_space<vmem>>, vector<1x2x128xf32>
    %306 = vector.shape_cast %305 : vector<1x2x128xf32> to vector<2x128xf32>
    %c0_120 = arith.constant 0 : index
    %c0_121 = arith.constant 0 : index
    %307 = vector.load %arg6[%c0_120, %c0_121] : memref<32x128xf32, #tpu.memory_space<vmem>>, vector<32x128xf32>
    %cst_122 = arith.constant dense<0.000000e+00> : vector<2x128xf32>
    %308 = tpu.matmul %303, %307, %cst_122 {dimension_numbers = #tpu.dot_dimension_numbers<[1], [0], [0], [1], [0, 0, 1, 1], [], []>} : vector<2x32xf32>, vector<32x128xf32>, vector<2x128xf32> -> vector<2x128xf32>
    %309 = arith.addf %306, %308 : vector<2x128xf32>
    %310 = vector.extract_strided_slice %309 {offsets = [0, 0], sizes = [2, 96], strides = [1, 1]} : vector<2x128xf32> to vector<2x96xf32>
    %311 = arith.negf %310 : vector<2x96xf32>
    %312 = math.exp %311 : vector<2x96xf32>
    %cst_123 = arith.constant 1.000000e+00 : f32
    %313 = vector.broadcast %cst_123 : f32 to vector<2x96xf32>
    %314 = arith.addf %313, %312 : vector<2x96xf32>
    %315 = arith.divf %313, %314 : vector<2x96xf32>
    %316 = vector.extract_strided_slice %309 {offsets = [0, 96], sizes = [2, 32], strides = [1, 1]} : vector<2x128xf32> to vector<2x32xf32>
    %317 = math.tanh %316 : vector<2x32xf32>
    %318 = vector.extract_strided_slice %315 {offsets = [0, 32], sizes = [2, 32], strides = [1, 1]} : vector<2x96xf32> to vector<2x32xf32>
    %319 = arith.mulf %318, %300 : vector<2x32xf32>
    %320 = vector.extract_strided_slice %315 {offsets = [0, 0], sizes = [2, 32], strides = [1, 1]} : vector<2x96xf32> to vector<2x32xf32>
    %321 = arith.mulf %320, %317 : vector<2x32xf32>
    %322 = arith.addf %319, %321 : vector<2x32xf32>
    %323 = vector.extract_strided_slice %315 {offsets = [0, 64], sizes = [2, 32], strides = [1, 1]} : vector<2x96xf32> to vector<2x32xf32>
    %324 = math.tanh %322 : vector<2x32xf32>
    %325 = arith.mulf %323, %324 : vector<2x32xf32>
    %c4_i32_124 = arith.constant 4 : i32
    %326 = arith.index_cast %c4_i32_124 : i32 to index
    %c0_125 = arith.constant 0 : index
    %c0_126 = arith.constant 0 : index
    %327 = vector.load %arg11[%326, %c0_125, %c0_126] : memref<8x2x128xf32, #tpu.memory_space<vmem>>, vector<1x2x128xf32>
    %328 = vector.shape_cast %327 : vector<1x2x128xf32> to vector<2x128xf32>
    %c0_127 = arith.constant 0 : index
    %c0_128 = arith.constant 0 : index
    %329 = vector.load %arg6[%c0_127, %c0_128] : memref<32x128xf32, #tpu.memory_space<vmem>>, vector<32x128xf32>
    %cst_129 = arith.constant dense<0.000000e+00> : vector<2x128xf32>
    %330 = tpu.matmul %325, %329, %cst_129 {dimension_numbers = #tpu.dot_dimension_numbers<[1], [0], [0], [1], [0, 0, 1, 1], [], []>} : vector<2x32xf32>, vector<32x128xf32>, vector<2x128xf32> -> vector<2x128xf32>
    %331 = arith.addf %328, %330 : vector<2x128xf32>
    %332 = vector.extract_strided_slice %331 {offsets = [0, 0], sizes = [2, 96], strides = [1, 1]} : vector<2x128xf32> to vector<2x96xf32>
    %333 = arith.negf %332 : vector<2x96xf32>
    %334 = math.exp %333 : vector<2x96xf32>
    %cst_130 = arith.constant 1.000000e+00 : f32
    %335 = vector.broadcast %cst_130 : f32 to vector<2x96xf32>
    %336 = arith.addf %335, %334 : vector<2x96xf32>
    %337 = arith.divf %335, %336 : vector<2x96xf32>
    %338 = vector.extract_strided_slice %331 {offsets = [0, 96], sizes = [2, 32], strides = [1, 1]} : vector<2x128xf32> to vector<2x32xf32>
    %339 = math.tanh %338 : vector<2x32xf32>
    %340 = vector.extract_strided_slice %337 {offsets = [0, 32], sizes = [2, 32], strides = [1, 1]} : vector<2x96xf32> to vector<2x32xf32>
    %341 = arith.mulf %340, %322 : vector<2x32xf32>
    %342 = vector.extract_strided_slice %337 {offsets = [0, 0], sizes = [2, 32], strides = [1, 1]} : vector<2x96xf32> to vector<2x32xf32>
    %343 = arith.mulf %342, %339 : vector<2x32xf32>
    %344 = arith.addf %341, %343 : vector<2x32xf32>
    %345 = vector.extract_strided_slice %337 {offsets = [0, 64], sizes = [2, 32], strides = [1, 1]} : vector<2x96xf32> to vector<2x32xf32>
    %346 = math.tanh %344 : vector<2x32xf32>
    %347 = arith.mulf %345, %346 : vector<2x32xf32>
    %c5_i32_131 = arith.constant 5 : i32
    %348 = arith.index_cast %c5_i32_131 : i32 to index
    %c0_132 = arith.constant 0 : index
    %c0_133 = arith.constant 0 : index
    %349 = vector.load %arg11[%348, %c0_132, %c0_133] : memref<8x2x128xf32, #tpu.memory_space<vmem>>, vector<1x2x128xf32>
    %350 = vector.shape_cast %349 : vector<1x2x128xf32> to vector<2x128xf32>
    %c0_134 = arith.constant 0 : index
    %c0_135 = arith.constant 0 : index
    %351 = vector.load %arg6[%c0_134, %c0_135] : memref<32x128xf32, #tpu.memory_space<vmem>>, vector<32x128xf32>
    %cst_136 = arith.constant dense<0.000000e+00> : vector<2x128xf32>
    %352 = tpu.matmul %347, %351, %cst_136 {dimension_numbers = #tpu.dot_dimension_numbers<[1], [0], [0], [1], [0, 0, 1, 1], [], []>} : vector<2x32xf32>, vector<32x128xf32>, vector<2x128xf32> -> vector<2x128xf32>
    %353 = arith.addf %350, %352 : vector<2x128xf32>
    %354 = vector.extract_strided_slice %353 {offsets = [0, 0], sizes = [2, 96], strides = [1, 1]} : vector<2x128xf32> to vector<2x96xf32>
    %355 = arith.negf %354 : vector<2x96xf32>
    %356 = math.exp %355 : vector<2x96xf32>
    %cst_137 = arith.constant 1.000000e+00 : f32
    %357 = vector.broadcast %cst_137 : f32 to vector<2x96xf32>
    %358 = arith.addf %357, %356 : vector<2x96xf32>
    %359 = arith.divf %357, %358 : vector<2x96xf32>
    %360 = vector.extract_strided_slice %353 {offsets = [0, 96], sizes = [2, 32], strides = [1, 1]} : vector<2x128xf32> to vector<2x32xf32>
    %361 = math.tanh %360 : vector<2x32xf32>
    %362 = vector.extract_strided_slice %359 {offsets = [0, 32], sizes = [2, 32], strides = [1, 1]} : vector<2x96xf32> to vector<2x32xf32>
    %363 = arith.mulf %362, %344 : vector<2x32xf32>
    %364 = vector.extract_strided_slice %359 {offsets = [0, 0], sizes = [2, 32], strides = [1, 1]} : vector<2x96xf32> to vector<2x32xf32>
    %365 = arith.mulf %364, %361 : vector<2x32xf32>
    %366 = arith.addf %363, %365 : vector<2x32xf32>
    %367 = vector.extract_strided_slice %359 {offsets = [0, 64], sizes = [2, 32], strides = [1, 1]} : vector<2x96xf32> to vector<2x32xf32>
    %368 = math.tanh %366 : vector<2x32xf32>
    %369 = arith.mulf %367, %368 : vector<2x32xf32>
    %c6_i32_138 = arith.constant 6 : i32
    %370 = arith.index_cast %c6_i32_138 : i32 to index
    %c0_139 = arith.constant 0 : index
    %c0_140 = arith.constant 0 : index
    %371 = vector.load %arg11[%370, %c0_139, %c0_140] : memref<8x2x128xf32, #tpu.memory_space<vmem>>, vector<1x2x128xf32>
    %372 = vector.shape_cast %371 : vector<1x2x128xf32> to vector<2x128xf32>
    %c0_141 = arith.constant 0 : index
    %c0_142 = arith.constant 0 : index
    %373 = vector.load %arg6[%c0_141, %c0_142] : memref<32x128xf32, #tpu.memory_space<vmem>>, vector<32x128xf32>
    %cst_143 = arith.constant dense<0.000000e+00> : vector<2x128xf32>
    %374 = tpu.matmul %369, %373, %cst_143 {dimension_numbers = #tpu.dot_dimension_numbers<[1], [0], [0], [1], [0, 0, 1, 1], [], []>} : vector<2x32xf32>, vector<32x128xf32>, vector<2x128xf32> -> vector<2x128xf32>
    %375 = arith.addf %372, %374 : vector<2x128xf32>
    %376 = vector.extract_strided_slice %375 {offsets = [0, 0], sizes = [2, 96], strides = [1, 1]} : vector<2x128xf32> to vector<2x96xf32>
    %377 = arith.negf %376 : vector<2x96xf32>
    %378 = math.exp %377 : vector<2x96xf32>
    %cst_144 = arith.constant 1.000000e+00 : f32
    %379 = vector.broadcast %cst_144 : f32 to vector<2x96xf32>
    %380 = arith.addf %379, %378 : vector<2x96xf32>
    %381 = arith.divf %379, %380 : vector<2x96xf32>
    %382 = vector.extract_strided_slice %375 {offsets = [0, 96], sizes = [2, 32], strides = [1, 1]} : vector<2x128xf32> to vector<2x32xf32>
    %383 = math.tanh %382 : vector<2x32xf32>
    %384 = vector.extract_strided_slice %381 {offsets = [0, 32], sizes = [2, 32], strides = [1, 1]} : vector<2x96xf32> to vector<2x32xf32>
    %385 = arith.mulf %384, %366 : vector<2x32xf32>
    %386 = vector.extract_strided_slice %381 {offsets = [0, 0], sizes = [2, 32], strides = [1, 1]} : vector<2x96xf32> to vector<2x32xf32>
    %387 = arith.mulf %386, %383 : vector<2x32xf32>
    %388 = arith.addf %385, %387 : vector<2x32xf32>
    %389 = vector.extract_strided_slice %381 {offsets = [0, 64], sizes = [2, 32], strides = [1, 1]} : vector<2x96xf32> to vector<2x32xf32>
    %390 = math.tanh %388 : vector<2x32xf32>
    %391 = arith.mulf %389, %390 : vector<2x32xf32>
    %c7_i32_145 = arith.constant 7 : i32
    %392 = arith.index_cast %c7_i32_145 : i32 to index
    %c0_146 = arith.constant 0 : index
    %c0_147 = arith.constant 0 : index
    %393 = vector.load %arg11[%392, %c0_146, %c0_147] : memref<8x2x128xf32, #tpu.memory_space<vmem>>, vector<1x2x128xf32>
    %394 = vector.shape_cast %393 : vector<1x2x128xf32> to vector<2x128xf32>
    %c0_148 = arith.constant 0 : index
    %c0_149 = arith.constant 0 : index
    %395 = vector.load %arg6[%c0_148, %c0_149] : memref<32x128xf32, #tpu.memory_space<vmem>>, vector<32x128xf32>
    %cst_150 = arith.constant dense<0.000000e+00> : vector<2x128xf32>
    %396 = tpu.matmul %391, %395, %cst_150 {dimension_numbers = #tpu.dot_dimension_numbers<[1], [0], [0], [1], [0, 0, 1, 1], [], []>} : vector<2x32xf32>, vector<32x128xf32>, vector<2x128xf32> -> vector<2x128xf32>
    %397 = arith.addf %394, %396 : vector<2x128xf32>
    %398 = vector.extract_strided_slice %397 {offsets = [0, 0], sizes = [2, 96], strides = [1, 1]} : vector<2x128xf32> to vector<2x96xf32>
    %399 = arith.negf %398 : vector<2x96xf32>
    %400 = math.exp %399 : vector<2x96xf32>
    %cst_151 = arith.constant 1.000000e+00 : f32
    %401 = vector.broadcast %cst_151 : f32 to vector<2x96xf32>
    %402 = arith.addf %401, %400 : vector<2x96xf32>
    %403 = arith.divf %401, %402 : vector<2x96xf32>
    %404 = vector.extract_strided_slice %397 {offsets = [0, 96], sizes = [2, 32], strides = [1, 1]} : vector<2x128xf32> to vector<2x32xf32>
    %405 = math.tanh %404 : vector<2x32xf32>
    %406 = vector.extract_strided_slice %403 {offsets = [0, 32], sizes = [2, 32], strides = [1, 1]} : vector<2x96xf32> to vector<2x32xf32>
    %407 = arith.mulf %406, %388 : vector<2x32xf32>
    %408 = vector.extract_strided_slice %403 {offsets = [0, 0], sizes = [2, 32], strides = [1, 1]} : vector<2x96xf32> to vector<2x32xf32>
    %409 = arith.mulf %408, %405 : vector<2x32xf32>
    %410 = arith.addf %407, %409 : vector<2x32xf32>
    %411 = vector.extract_strided_slice %403 {offsets = [0, 64], sizes = [2, 32], strides = [1, 1]} : vector<2x96xf32> to vector<2x32xf32>
    %412 = math.tanh %410 : vector<2x32xf32>
    %413 = arith.mulf %411, %412 : vector<2x32xf32>
    %c8_i32_152 = arith.constant 8 : i32
    %c0_153 = arith.constant 0 : index
    %c0_154 = arith.constant 0 : index
    %414 = vector.load %arg8[%c0_153, %c0_154] : memref<32x5xf32, #tpu.memory_space<vmem>>, vector<32x5xf32>
    %cst_155 = arith.constant dense<0.000000e+00> : vector<2x5xf32>
    %415 = tpu.matmul %413, %414, %cst_155 {dimension_numbers = #tpu.dot_dimension_numbers<[1], [0], [0], [1], [0, 0, 1, 1], [], []>} : vector<2x32xf32>, vector<32x5xf32>, vector<2x5xf32> -> vector<2x5xf32>
    %c0_156 = arith.constant 0 : index
    %c0_157 = arith.constant 0 : index
    %416 = vector.load %arg9[%c0_156, %c0_157] : memref<1x5xf32, #tpu.memory_space<vmem>>, vector<1x5xf32>
    %417 = vector.broadcast %416 : vector<1x5xf32> to vector<2x5xf32>
    %418 = arith.addf %415, %417 : vector<2x5xf32>
    %c0_158 = arith.constant 0 : index
    %c0_159 = arith.constant 0 : index
    %419 = vector.load %arg10[%c0_158, %c0_159] : memref<2x5xf32, #tpu.memory_space<vmem>>, vector<2x5xf32>
    tpu.vector_store %arg10[%c0_158, %c0_159], %418 {strides = array<i32>} : memref<2x5xf32, #tpu.memory_space<vmem>>, vector<2x5xf32>,
    return
  }
  func.func @transform_0(%arg0: i32) -> (i32, i32, i32) {
    %c0_i32 = arith.constant 0 : i32
    %c0_i32_0 = arith.constant 0 : i32
    %c0_i32_1 = arith.constant 0 : i32
    return %c0_i32, %arg0, %c0_i32_0 : i32, i32, i32
  }
  func.func @transform_1(%arg0: i32) -> (i32, i32) {
    %c0_i32 = arith.constant 0 : i32
    %c0_i32_0 = arith.constant 0 : i32
    %c0_i32_1 = arith.constant 0 : i32
    return %c0_i32, %c0_i32_0 : i32, i32
  }
  func.func @transform_2(%arg0: i32) -> (i32, i32) {
    %c0_i32 = arith.constant 0 : i32
    %c0_i32_0 = arith.constant 0 : i32
    %c0_i32_1 = arith.constant 0 : i32
    return %c0_i32, %c0_i32_0 : i32, i32
  }
  func.func @transform_3(%arg0: i32) -> (i32, i32) {
    %c0_i32 = arith.constant 0 : i32
    %c0_i32_0 = arith.constant 0 : i32
    %c0_i32_1 = arith.constant 0 : i32
    return %c0_i32, %c0_i32_0 : i32, i32
  }
  func.func @transform_4(%arg0: i32) -> (i32, i32) {
    %c0_i32 = arith.constant 0 : i32
    %c0_i32_0 = arith.constant 0 : i32
    %c0_i32_1 = arith.constant 0 : i32
    return %c0_i32, %c0_i32_0 : i32, i32
  }
  func.func @transform_5(%arg0: i32) -> (i32, i32) {
    %c0_i32 = arith.constant 0 : i32
    %c0_i32_0 = arith.constant 0 : i32
    %c0_i32_1 = arith.constant 0 : i32
    return %c0_i32, %c0_i32_0 : i32, i32
  }
  func.func @transform_6(%arg0: i32) -> (i32, i32) {
    %c0_i32 = arith.constant 0 : i32
    %c0_i32_0 = arith.constant 0 : i32
    %c0_i32_1 = arith.constant 0 : i32
    return %c0_i32, %c0_i32_0 : i32, i32
  }
  func.func @transform_7(%arg0: i32) -> (i32, i32) {
    %c0_i32 = arith.constant 0 : i32
    %c0_i32_0 = arith.constant 0 : i32
    %c0_i32_1 = arith.constant 0 : i32
    return %c0_i32, %c0_i32_0 : i32, i32
  }
  func.func @transform_8(%arg0: i32) -> (i32, i32) {
    %c0_i32 = arith.constant 0 : i32
    %c0_i32_0 = arith.constant 0 : i32
    %c0_i32_1 = arith.constant 0 : i32
    return %c0_i32, %c0_i32_0 : i32, i32
  }
  func.func @transform_9(%arg0: i32) -> (i32, i32) {
    %c0_i32 = arith.constant 0 : i32
    %c0_i32_0 = arith.constant 0 : i32
    return %arg0, %c0_i32 : i32, i32
  }
}

</mosaic_0001>

<bundles_post_ra>
// kernel: lstm_model_forward.1
= control target key start
LH: loop header
LB: loop body
LE: loop exit
PB: predicated region body
PF: predicated region fallthrough
CT: control target
= control target key end

     0   :  { %14 = vsyncpa [#allocation5], 0  ;;  %s3208_s0 = inlined_call_operand.vmem [shape: f32[8,2,16], index: 0, kind: input, shape index: {}]   ;;  %s3209_s1 = inlined_call_operand.vmem [shape: f32[16,128], index: 1, kind: input, shape index: {}]   ;;  %s3210_s2 = inlined_call_operand.vmem [shape: f32[32,128], index: 2, kind: input, shape index: {}]   ;;  %s3211_s3 = inlined_call_operand.vmem [shape: f32[1,128], index: 3, kind: input, shape index: {}]   ;;  %s3212_s4 = inlined_call_operand.vmem [shape: f32[32,128], index: 4, kind: input, shape index: {}]   ;;  %s3213_s5 = inlined_call_operand.hbm [shape: f32[32,128], index: 5, kind: input, shape index: {}]   ;;  %s3214_s6 = inlined_call_operand.vmem [shape: f32[1,128], index: 6, kind: input, shape index: {}]   ;;  %s3215_s7 = inlined_call_operand.vmem [shape: f32[32,5], index: 7, kind: input, shape index: {}]   ;;  %s3216_s8 = inlined_call_operand.hbm [shape: f32[1,5], index: 8, kind: input, shape index: {}]   ;;  %s3217_s9 = inlined_call_operand.hbm [shape: f32[2,5], index: 9, kind: output, shape index: {}]  }
   0x1   :  { %15 = vsyncpa [#allocation8], 0 }
   0x2   :  { %16 = vsyncpa [#allocation6], 0  ;;  %s2776_s30 = smov [#allocation4]  }
   0x3   :  { %s32_s10 = sshll.u32 %s2776_s30, 4  ;;  %s33_s10 = int_to_ptr.vmem [resolvable:$true] %s32_s10 }
   0x4   :  { %s2718_s11 = scalar_lea.vmem %s33_s10, 512  ;;  %p2723_p1 = scmp.lt.s32.totalorder %s33_s10, %s33_s10 }
   0x5   :  { %p2719_p0 = scmp.ne.s32.totalorder %s33_s10, %s2718_s11  ;;  %p2724_p2 = scmp.lt.s32.totalorder %s2718_s11, %s2718_s11 }
   0x7   :  { %p2725_p3 = por %p2724_p2, %p2723_p1 }
   0x9   :  { %p2726_p4 = pnand %p2725_p3, %p2719_p0 }
   0xb   :  { %2729 = shalt.err (!%p2726_p4)
}
   0xc   :  { %s2777_s12 = smov 128   ;;  %s2778_s13 = smov 8  }
   0xd   :  { %38 = dma.hbm_to_vmem [thread:$0]  %s3213_s5, 512, %s33_s10, [#allocation5], %s2777_s12, %s2777_s12, %s2778_s13  }
   0xe   :  { %s2779_s16 = smov [#allocation7]  }
   0xf   :  { %s49_s17 = sshll.u32 %s2779_s16, 4  ;;  %s50_s17 = int_to_ptr.vmem [resolvable:$true] %s49_s17 }
  0x10   :  { %s2738_s18 = scalar_lea.vmem %s50_s17, 16  ;;  %s2742_s19 = scalar_lea.vmem %s50_s17, 32 }
  0x11   :  { %p2739_p5 = scmp.ne.s32.totalorder %s50_s17, %s2738_s18  ;;  %p2743_p6 = scmp.lt.s32.totalorder %s50_s17, %s50_s17 }
  0x12   :  { %p2744_p7 = scmp.lt.s32.totalorder %s2742_s19, %s2738_s18 }
  0x14   :  { %p2745_p8 = por %p2744_p7, %p2743_p6 }
  0x16   :  { %p2746_p9 = pnand %p2745_p8, %p2739_p5 }
  0x18   :  { %2749 = shalt.err (!%p2746_p9)
}
  0x19   :  { %52 = dma.hbm_to_vmem [thread:$0]  %s3216_s8, 16, %s50_s17, [#allocation8]  }
  0x1a   :  { %2770 = dma.done.wait [#allocation5], 512  }
  0x1b   :  { %2771 = vsyncadd [#allocation5], 4294966784 }
  0x1c   :  { %2772 = dma.done.wait [#allocation8], 16  }
  0x1d   :  { %2773 = vsyncadd [#allocation8], 4294967280  ;;  %v89_v0 = vlaneseq  ;;  %v2780_v1 = vmov 1983009808   ;;  %v2781_v3 = vmov 0.0   ;;  %vm2782_vm0 = vmmov 0  }
  0x1e   :  { %v87_v2 = vunpack.c.l.s4 %v2780_v1  ;;  %2374 = vmatprep.subr.mxu1 %v2781_v3  ;;  %2382 = vmatprep.mubr.msk.f32.mxu1 %vm2782_vm0, %v2781_v3  ;;  %v68_v6 = vld [vmem:[%s3209_s1 + $0x8] sm:$0xff]  ;;  %v67_v7 = vld [vmem:[%s3209_s1] sm:$0xff]  ;;  %v2880_v20 = vld [vmem:[%s3210_s2 + $0x18] sm:$0xff]  ;;  %vm118_vm1 = vcmask 130048   ;;  %s2784_s24 = smov 64   ;;  %vm358_vm2 = vcmask 254976  }
  0x1f   :  { %v90_v5 = vshrl.u32 %v89_v0, 7  ;;  %v59_v8 = vld [vmem:[%s3208_s0] sm:$0x3]  ;;  %2367 = vmatprep.subr.mxu0 %v68_v6  ;;  %v60_v10 = vld [vmem:[%s3208_s0 + $0x2] sm:$0x3]  ;;  %v2885_v21 = vld [vmem:[%s3210_s2 + $0x10] sm:$0xff]  ;;  %2375 = vmatpush3.msra.mxu1 %v2880_v20 }
  0x20   :  { %v88_v4 = vunpack.c.0.s8 %v87_v2  ;;  %v61_v11 = vld [vmem:[%s3208_s0 + $0x4] sm:$0x3]  ;;  %v62_v12 = vld [vmem:[%s3208_s0 + $0x6] sm:$0x3]  ;;  %2368 = vmatpush3.msra.mxu0 %v68_v6  ;;  %v84_v13 = vcombine.low %v59_v8, %v60_v10  ;;  %v63_v15 = vld [vmem:[%s3208_s0 + $0x8] sm:$0x3]  ;;  %2376 = vmatprep.subr.mxu1 %v2781_v3 }
  0x21   :  { %v85_v14 = vcombine.low %v61_v11, %v62_v12  ;;  %v64_v16 = vld [vmem:[%s3208_s0 + $0xa] sm:$0x3]  ;;  %v65_v17 = vld [vmem:[%s3208_s0 + $0xc] sm:$0x3]  ;;  %2369 = vmatprep.subr.mxu0 %v67_v7  ;;  %v66_v18 = vld [vmem:[%s3208_s0 + $0xe] sm:$0x3]  ;;  %2377 = vmatpush3.msra.mxu1 %v2885_v21 }
  0x22   :  { %v2854_v9 = vsub.s32 %v88_v4, %v90_v5  ;;  %v101_v19 = vcombine.low %v63_v15, %v64_v16  ;;  %2370 = vmatpush3.msra.mxu0 %v67_v7  ;;  %v102_v24 = vcombine.low %v65_v17, %v66_v18  ;;  %v2895_v26 = vld [vmem:[%s3210_s2 + $0x8] sm:$0xff]  ;;  %2378 = vmatprep.subr.mxu1 %v2781_v3  ;;  %v2904_v29 = vld [vmem:[%s3210_s2] sm:$0xff]  ;;  %vm255_vm3 = vcmask 261120   ;;  %s2785_s19 = smov [#allocation9]  }
  0x23   :  { %2385 = vmatprep.subr.mxu0 %v2781_v3  ;;  %2379 = vmatpush3.msra.mxu1 %v2895_v26  ;;  %v2226_v31 = vld [vmem:[%s3211_s3] ss:$0 sm:$0xff]  ;;  %s2783_s3 = smov 32   ;;  %s2216_s20 = sshll.u32 %s2785_s19, 4  ;;  %vm2208_vm4 = vcmask 33792   ;;  %s2217_s20 = int_to_ptr.vmem [resolvable:$true] %s2216_s20 }
  0x24   :  { %v92_v22 = vrot.slane %v84_v13, %v2854_v9  ;;  %v99_v23 = vrot.slane %v85_v14, %v2854_v9  ;;  %v109_v25 = vrot.slane %v101_v19, %v2854_v9  ;;  %v116_v28 = vrot.slane %v102_v24, %v2854_v9  ;;  %2380 = vmatprep.subr.mxu1 %v2781_v3  ;;  %p2755_p11 = scmp.lt.s32.totalorder %s2217_s20, %s2217_s20 }
  0x25   :  { %2381 = vmatpush3.msra.mxu1 %v2904_v29 }
  0x26   :  { %v100_v27 = vcombine.low %v92_v22, %v99_v23  ;;  %v117_v30 = vcombine.low %v109_v25, %v116_v28  ;;  %2383 = vmatmul.mubr.f32.vlgmr.msra.gmra.mxu1 %v2781_v3  ;;  %2396 = vmatprep.subr.mxu1 %v2781_v3 }
  0x27   :  { %2397 = vmatpush3.msra.mxu1 %v2880_v20  ;;  %2404 = vmatprep.mubr.msk.f32.mxu1 %vm2782_vm0, %v2781_v3 }
  0x28   :  { %2371 = vmatprep.mubr.msk.f32.mxu0 %vm118_vm1, %v100_v27  ;;  %2398 = vmatprep.subr.mxu1 %v2781_v3 }
  0x29   :  { %2372 = vmatmul.mubr.msk.f32.vlgmr.msra.gmra.mxu0 %vm118_vm1, %v117_v30  ;;  %2399 = vmatpush3.msra.mxu1 %v2885_v21 }
  0x2a   :  { %2386 = vmatpush3.msra.mxu0 %v2880_v20  ;;  %2393 = vmatprep.mubr.msk.f32.mxu0 %vm2782_vm0, %v2781_v3 }
  0x2b   :  { %2387 = vmatprep.subr.mxu0 %v2781_v3  ;;  %2400 = vmatprep.subr.mxu1 %v2781_v3 }
  0x2c   :  { %2388 = vmatpush3.msra.mxu0 %v2885_v21  ;;  %2401 = vmatpush3.msra.mxu1 %v2895_v26 }
  0x2d   :  { %2389 = vmatprep.subr.mxu0 %v2781_v3  ;;  %2402 = vmatprep.subr.mxu1 %v2781_v3 }
  0x2e   :  { %2390 = vmatpush3.msra.mxu0 %v2895_v26  ;;  %2403 = vmatpush3.msra.mxu1 %v2904_v29 }
  0x2f   :  { %2391 = vmatprep.subr.mxu0 %v2781_v3  ;;  %2418 = vmatprep.subr.mxu1 %v2781_v3 }
  0x30   :  { %2392 = vmatpush3.msra.mxu0 %v2904_v29 }
  0x31   :  { %2407 = vmatprep.subr.mxu0 %v2781_v3 }
  0xe6   :  { %v325_v34 = vpop.f32.mrf.mxu1 }
  0xe8   :  { %v2384_v39 = vpop.f32.mrf.mxu1 }
  0xe9   :  { %v2373_v32 = vpop.f32.mrf.mxu0 }
  0xea   :  { %v195_v33 = vadd.f32 %v2373_v32, %v2226_v31 }
  0xeb   :  { %v189_v35 = vpop.f32.mrf.mxu0 }
  0xec   :  { %v217_v36 = vcombine.high %v195_v33, %v195_v33  ;;  %v224_v37 = vrot.slane %v195_v33, %v2854_v9  ;;  %2231 = vst.sshfl [vmem:[#allocation2 + $0x8] sm:$0x3 pattern:$0x76325410] %v195_v33  ;;  %v190_v38 = vadd.f32 %v2226_v31, %v189_v35 }
  0xee   :  { %v231_v40 = vrot.slane %v217_v36, %v2854_v9  ;;  %v232_v41 = vcombine.high %v224_v37, %v224_v37  ;;  %2232 = vst.sshfl [vmem:[#allocation2 + $0xc] sm:$0x3 pattern:$0x76325410] %v217_v36  ;;  %v200_v42 = vcombine.high %v190_v38, %v190_v38  ;;  %v207_v43 = vrot.slane %v190_v38, %v2854_v9 }
  0xef   :  { %2229 = vst.sshfl [vmem:[#allocation2] sm:$0x3 pattern:$0x76325410] %v190_v38 }
  0xf0   :  { %v233_v44 = vcombine.high %v231_v40, %v231_v40  ;;  %247 = vst [vmem:[#allocation2 + $0xa] sm:$0x3] %v232_v41  ;;  %v214_v45 = vrot.slane %v200_v42, %v2854_v9  ;;  %v215_v46 = vcombine.high %v207_v43, %v207_v43  ;;  %2230 = vst.sshfl [vmem:[#allocation2 + $0x4] sm:$0x3 pattern:$0x76325410] %v200_v42 }
  0xf2   :  { %249 = vst [vmem:[#allocation2 + $0xe] sm:$0x3] %v233_v44  ;;  %v216_v47 = vcombine.high %v214_v45, %v214_v45  ;;  %243 = vst [vmem:[#allocation2 + $0x2] sm:$0x3] %v215_v46 }
  0xf4   :  { %245 = vst [vmem:[#allocation2 + $0x6] sm:$0x3] %v216_v47 }
  0xf6   :  { %v250_v48 = vld [vmem:[#allocation2] sm:$0x3] }
  0xf7   :  { %v329_v49 = vadd.f32 %v325_v34, %v250_v48  ;;  %v470_v22 = vld [vmem:[#allocation2 + $0x4] sm:$0x3] }
  0xf9   :  { %2582 = vtanh.f32 %v329_v49  ;;  %v2233_v51 = vmul.f32 -1.442695, %v329_v49  ;;  %v361_v0 = vld [vmem:[#allocation2 + $0x2] sm:$0x3] }
  0xfb   :  { %2584 = vpow2.f32 %v2233_v51  ;;  %v579_v42 = vld [vmem:[#allocation2 + $0x6] sm:$0x3] }
 0x106   :  { %v2583_v50 = vpop.eup %2582 }
 0x107   :  { %339 = vrot.lane.b32.xlu0 %v2583_v50, %s2783_s3 }
 0x108   :  { %v2585_v52 = vpop.eup %2584 }
 0x109   :  { %v333_v53 = vadd.f32 1.0, %v2585_v52 }
 0x10b   :  { %2586 = vrcp.f32 %v333_v53 }
 0x118   :  { %v2587_v54 = vpop.eup %2586 }
 0x119   :  { %v337_v57 = vmul.f32 0.0, %v2587_v54 }
 0x179   :  { %v340_v55 = vpop.permute.xlu0 %339 }
 0x17a   :  { %v342_v56 = vmul.f32 %v2587_v54, %v340_v55 }
 0x17c   :  { %344 = vrot.lane.b32.xlu0 %v342_v56, %s2783_s3 }
 0x1ee   :  { %v345_v58 = vpop.permute.xlu0 %344 }
 0x1ef   :  { %v347_v59 = vadd.f32 %v345_v58, %v337_v57 }
 0x1f1   :  { %2588 = vtanh.f32 %v347_v59 }
 0x1fe   :  { %v2589_v60 = vpop.eup %2588 }
 0x1ff   :  { %350 = vrot.lane.b32.xlu1 %v2589_v60, %s2783_s3  ;;  %v688_v60 = vld [vmem:[#allocation2 + $0x8] sm:$0x3] }
 0x271   :  { %v351_v61 = vpop.permute.xlu1 %350 }
 0x272   :  { %v353_v62 = vmul.f32 %v2587_v54, %v351_v61 }
 0x274   :  { %355 = vrot.lane.b32.xlu1 %v353_v62, %s2784_s24 }
 0x2e6   :  { %v356_v63 = vpop.permute.xlu1 %355 }
 0x2e7   :  { %359 = vst.msk [vmem:[#allocation3] sm:$0x3] %vm358_vm2, %v356_v63  ;;  %2394 = vmatmul.mubr.msk.f32.vlgmr.msra.gmra.mxu0 %vm255_vm3, %v356_v63 }
 0x2e8   :  { %2408 = vmatpush3.msra.mxu0 %v2880_v20  ;;  %2415 = vmatprep.mubr.msk.f32.mxu0 %vm2782_vm0, %v2781_v3 }
 0x2e9   :  { %2409 = vmatprep.subr.mxu0 %v2781_v3 }
 0x2ea   :  { %2410 = vmatpush3.msra.mxu0 %v2885_v21 }
 0x2eb   :  { %2411 = vmatprep.subr.mxu0 %v2781_v3 }
 0x2ec   :  { %2412 = vmatpush3.msra.mxu0 %v2895_v26 }
 0x2ed   :  { %2413 = vmatprep.subr.mxu0 %v2781_v3 }
 0x2ee   :  { %2414 = vmatpush3.msra.mxu0 %v2904_v29 }
 0x2ef   :  { %2429 = vmatprep.subr.mxu0 %v2781_v3 }
 0x3a7   :  { %v434_v1 = vpop.f32.mrf.mxu0 }
 0x3a8   :  { %v438_v2 = vadd.f32 %v434_v1, %v361_v0 }
 0x3a9   :  { %v2395_v4 = vpop.f32.mrf.mxu0 }
 0x3aa   :  { %2590 = vtanh.f32 %v438_v2  ;;  %v2235_v6 = vmul.f32 -1.442695, %v438_v2 }
 0x3ac   :  { %2592 = vpow2.f32 %v2235_v6 }
 0x3b7   :  { %v2591_v5 = vpop.eup %2590 }
 0x3b8   :  { %448 = vrot.lane.b32.xlu0 %v2591_v5, %s2783_s3 }
 0x3b9   :  { %v2593_v7 = vpop.eup %2592 }
 0x3ba   :  { %v442_v8 = vadd.f32 1.0, %v2593_v7 }
 0x3bc   :  { %2594 = vrcp.f32 %v442_v8 }
 0x3c9   :  { %v2595_v10 = vpop.eup %2594 }
 0x3ca   :  { %v446_v13 = vmul.f32 %v2595_v10, %v347_v59 }
 0x42a   :  { %v449_v11 = vpop.permute.xlu0 %448 }
 0x42b   :  { %v451_v12 = vmul.f32 %v2595_v10, %v449_v11 }
 0x42d   :  { %453 = vrot.lane.b32.xlu1 %v451_v12, %s2783_s3 }
 0x49f   :  { %v454_v14 = vpop.permute.xlu1 %453 }
 0x4a0   :  { %v456_v15 = vadd.f32 %v454_v14, %v446_v13 }
 0x4a2   :  { %2596 = vtanh.f32 %v456_v15 }
 0x4af   :  { %v2597_v16 = vpop.eup %2596 }
 0x4b0   :  { %459 = vrot.lane.b32.xlu0 %v2597_v16, %s2783_s3  ;;  %v797_v16 = vld [vmem:[#allocation2 + $0xa] sm:$0x3] }
 0x522   :  { %v460_v17 = vpop.permute.xlu0 %459 }
 0x523   :  { %v462_v18 = vmul.f32 %v2595_v10, %v460_v17 }
 0x525   :  { %464 = vrot.lane.b32.xlu1 %v462_v18, %s2784_s24 }
 0x597   :  { %v465_v19 = vpop.permute.xlu1 %464 }
 0x598   :  { %468 = vst.msk [vmem:[#allocation3 + $0x2] sm:$0x3] %vm358_vm2, %v465_v19  ;;  %2405 = vmatmul.mubr.msk.f32.vlgmr.msra.gmra.mxu1 %vm255_vm3, %v465_v19 }
 0x599   :  { %2419 = vmatpush3.msra.mxu1 %v2880_v20  ;;  %2426 = vmatprep.mubr.msk.f32.mxu1 %vm2782_vm0, %v2781_v3 }
 0x59a   :  { %2420 = vmatprep.subr.mxu1 %v2781_v3 }
 0x59b   :  { %2421 = vmatpush3.msra.mxu1 %v2885_v21 }
 0x59c   :  { %2422 = vmatprep.subr.mxu1 %v2781_v3 }
 0x59d   :  { %2423 = vmatpush3.msra.mxu1 %v2895_v26 }
 0x59e   :  { %2424 = vmatprep.subr.mxu1 %v2781_v3 }
 0x59f   :  { %2425 = vmatpush3.msra.mxu1 %v2904_v29 }
 0x5a0   :  { %2440 = vmatprep.subr.mxu1 %v2781_v3 }
 0x658   :  { %v543_v23 = vpop.f32.mrf.mxu1 }
 0x659   :  { %v547_v24 = vadd.f32 %v543_v23, %v470_v22 }
 0x65a   :  { %v2406_v25 = vpop.f32.mrf.mxu1 }
 0x65b   :  { %2598 = vtanh.f32 %v547_v24  ;;  %v2237_v28 = vmul.f32 -1.442695, %v547_v24 }
 0x65d   :  { %2600 = vpow2.f32 %v2237_v28 }
 0x668   :  { %v2599_v27 = vpop.eup %2598 }
 0x669   :  { %557 = vrot.lane.b32.xlu0 %v2599_v27, %s2783_s3 }
 0x66a   :  { %v2601_v30 = vpop.eup %2600 }
 0x66b   :  { %v551_v31 = vadd.f32 1.0, %v2601_v30 }
 0x66d   :  { %2602 = vrcp.f32 %v551_v31 }
 0x67a   :  { %v2603_v32 = vpop.eup %2602 }
 0x67b   :  { %v555_v35 = vmul.f32 %v2603_v32, %v456_v15 }
 0x6db   :  { %v558_v33 = vpop.permute.xlu0 %557 }
 0x6dc   :  { %v560_v34 = vmul.f32 %v2603_v32, %v558_v33 }
 0x6de   :  { %562 = vrot.lane.b32.xlu1 %v560_v34, %s2783_s3  ;;  %v1124_v34 = vld [vmem:[#allocation3 + $0x2] sm:$0x3] }
 0x750   :  { %v563_v36 = vpop.permute.xlu1 %562 }
 0x751   :  { %v565_v37 = vadd.f32 %v563_v36, %v555_v35 }
 0x753   :  { %2604 = vtanh.f32 %v565_v37 }
 0x760   :  { %v2605_v38 = vpop.eup %2604 }
 0x761   :  { %568 = vrot.lane.b32.xlu0 %v2605_v38, %s2783_s3 }
 0x7d3   :  { %v569_v39 = vpop.permute.xlu0 %568 }
 0x7d4   :  { %v571_v40 = vmul.f32 %v2603_v32, %v569_v39 }
 0x7d6   :  { %573 = vrot.lane.b32.xlu1 %v571_v40, %s2784_s24 }
 0x848   :  { %v574_v41 = vpop.permute.xlu1 %573 }
 0x849   :  { %577 = vst.msk [vmem:[#allocation3 + $0x4] sm:$0x3] %vm358_vm2, %v574_v41  ;;  %2416 = vmatmul.mubr.msk.f32.vlgmr.msra.gmra.mxu0 %vm255_vm3, %v574_v41 }
 0x84a   :  { %2430 = vmatpush3.msra.mxu0 %v2880_v20  ;;  %2437 = vmatprep.mubr.msk.f32.mxu0 %vm2782_vm0, %v2781_v3 }
 0x84b   :  { %2431 = vmatprep.subr.mxu0 %v2781_v3 }
 0x84c   :  { %2432 = vmatpush3.msra.mxu0 %v2885_v21 }
 0x84d   :  { %2433 = vmatprep.subr.mxu0 %v2781_v3 }
 0x84e   :  { %2434 = vmatpush3.msra.mxu0 %v2895_v26 }
 0x84f   :  { %2435 = vmatprep.subr.mxu0 %v2781_v3 }
 0x850   :  { %2436 = vmatpush3.msra.mxu0 %v2904_v29  ;;  %v1125_v35 = vld [vmem:[#allocation3 + $0x4] sm:$0x3] }
 0x851   :  { %2451 = vmatprep.subr.mxu0 %v2781_v3 }
 0x909   :  { %v652_v43 = vpop.f32.mrf.mxu0 }
 0x90a   :  { %v656_v44 = vadd.f32 %v652_v43, %v579_v42  ;;  %v906_v43 = vld [vmem:[#allocation2 + $0xc] sm:$0x3] }
 0x90b   :  { %v2417_v45 = vpop.f32.mrf.mxu0 }
 0x90c   :  { %2606 = vtanh.f32 %v656_v44  ;;  %v2239_v47 = vmul.f32 -1.442695, %v656_v44 }
 0x90e   :  { %2608 = vpow2.f32 %v2239_v47 }
 0x919   :  { %v2607_v46 = vpop.eup %2606 }
 0x91a   :  { %666 = vrot.lane.b32.xlu0 %v2607_v46, %s2783_s3 }
 0x91b   :  { %v2609_v48 = vpop.eup %2608 }
 0x91c   :  { %v660_v49 = vadd.f32 1.0, %v2609_v48 }
 0x91e   :  { %2610 = vrcp.f32 %v660_v49 }
 0x92b   :  { %v2611_v50 = vpop.eup %2610 }
 0x92c   :  { %v664_v53 = vmul.f32 %v2611_v50, %v565_v37  ;;  %v1123_v37 = vld [vmem:[#allocation3] sm:$0x3] }
 0x92d   :  { %v1150_v38 = vcombine.low %v1123_v37, %v1124_v34 }
 0x92f   :  { %v1158_v40 = vrot.slane %v1150_v38, %v2854_v9 }
 0x98c   :  { %v667_v51 = vpop.permute.xlu0 %666 }
 0x98d   :  { %v669_v52 = vmul.f32 %v2611_v50, %v667_v51 }
 0x98f   :  { %671 = vrot.lane.b32.xlu1 %v669_v52, %s2783_s3 }
 0xa01   :  { %v672_v54 = vpop.permute.xlu1 %671 }
 0xa02   :  { %v674_v55 = vadd.f32 %v672_v54, %v664_v53 }
 0xa04   :  { %2612 = vtanh.f32 %v674_v55 }
 0xa11   :  { %v2613_v56 = vpop.eup %2612 }
 0xa12   :  { %677 = vrot.lane.b32.xlu0 %v2613_v56, %s2783_s3 }
 0xa84   :  { %v678_v57 = vpop.permute.xlu0 %677 }
 0xa85   :  { %v680_v58 = vmul.f32 %v2611_v50, %v678_v57 }
 0xa87   :  { %682 = vrot.lane.b32.xlu1 %v680_v58, %s2784_s24 }
 0xaf9   :  { %v683_v59 = vpop.permute.xlu1 %682 }
 0xafa   :  { %686 = vst.msk [vmem:[#allocation3 + $0x6] sm:$0x3] %vm358_vm2, %v683_v59  ;;  %2427 = vmatmul.mubr.msk.f32.vlgmr.msra.gmra.mxu1 %vm255_vm3, %v683_v59 }
 0xafb   :  { %2441 = vmatpush3.msra.mxu1 %v2880_v20  ;;  %2448 = vmatprep.mubr.msk.f32.mxu1 %vm2782_vm0, %v2781_v3 }
 0xafc   :  { %2442 = vmatprep.subr.mxu1 %v2781_v3 }
 0xafd   :  { %2443 = vmatpush3.msra.mxu1 %v2885_v21 }
 0xafe   :  { %2444 = vmatprep.subr.mxu1 %v2781_v3 }
 0xaff   :  { %2445 = vmatpush3.msra.mxu1 %v2895_v26 }
 0xb00   :  { %2446 = vmatprep.subr.mxu1 %v2781_v3 }
 0xb01   :  { %2447 = vmatpush3.msra.mxu1 %v2904_v29  ;;  %v1126_v33 = vld [vmem:[#allocation3 + $0x6] sm:$0x3] }
 0xb02   :  { %v1151_v36 = vcombine.low %v1125_v35, %v1126_v33 }
 0xb04   :  { %v1165_v39 = vrot.slane %v1151_v36, %v2854_v9  ;;  %v2248_v36 = vld [vmem:[%s3214_s6] ss:$0 sm:$0xff] }
 0xb06   :  { %v1166_v42 = vcombine.low %v1158_v40, %v1165_v39 }
 0xbba   :  { %v761_v61 = vpop.f32.mrf.mxu1 }
 0xbbb   :  { %v765_v62 = vadd.f32 %v761_v61, %v688_v60  ;;  %v1015_v61 = vld [vmem:[#allocation2 + $0xe] sm:$0x3] }
 0xbbc   :  { %v2428_v63 = vpop.f32.mrf.mxu1 }
 0xbbd   :  { %2614 = vtanh.f32 %v765_v62  ;;  %v2241_v1 = vmul.f32 -1.442695, %v765_v62 }
 0xbbf   :  { %2616 = vpow2.f32 %v2241_v1 }
 0xbca   :  { %v2615_v0 = vpop.eup %2614 }
 0xbcb   :  { %775 = vrot.lane.b32.xlu0 %v2615_v0, %s2783_s3 }
 0xbcc   :  { %v2617_v2 = vpop.eup %2616 }
 0xbcd   :  { %v769_v4 = vadd.f32 1.0, %v2617_v2 }
 0xbcf   :  { %2618 = vrcp.f32 %v769_v4 }
 0xbdc   :  { %v2619_v5 = vpop.eup %2618 }
 0xbdd   :  { %v773_v8 = vmul.f32 %v2619_v5, %v674_v55 }
 0xc3d   :  { %v776_v6 = vpop.permute.xlu0 %775 }
 0xc3e   :  { %v778_v7 = vmul.f32 %v2619_v5, %v776_v6 }
 0xc40   :  { %780 = vrot.lane.b32.xlu1 %v778_v7, %s2783_s3 }
 0xcb2   :  { %v781_v10 = vpop.permute.xlu1 %780 }
 0xcb3   :  { %v783_v11 = vadd.f32 %v781_v10, %v773_v8 }
 0xcb5   :  { %2620 = vtanh.f32 %v783_v11 }
 0xcc2   :  { %v2621_v12 = vpop.eup %2620 }
 0xcc3   :  { %786 = vrot.lane.b32.xlu0 %v2621_v12, %s2783_s3 }
 0xd35   :  { %v787_v13 = vpop.permute.xlu0 %786 }
 0xd36   :  { %v789_v14 = vmul.f32 %v2619_v5, %v787_v13 }
 0xd38   :  { %791 = vrot.lane.b32.xlu1 %v789_v14, %s2784_s24  ;;  %v1134_v14 = vld [vmem:[%s3212_s4 + $0x18] sm:$0xff] }
 0xd39   :  { %2462 = vmatprep.subr.mxu1 %v1134_v14 }
 0xdaa   :  { %v792_v15 = vpop.permute.xlu1 %791 }
 0xdab   :  { %795 = vst.msk [vmem:[#allocation3 + $0x8] sm:$0x3] %vm358_vm2, %v792_v15  ;;  %2438 = vmatmul.mubr.msk.f32.vlgmr.msra.gmra.mxu0 %vm255_vm3, %v792_v15  ;;  %v1133_v15 = vld [vmem:[%s3212_s4 + $0x10] sm:$0xff] }
 0xdac   :  { %2452 = vmatpush3.msra.mxu0 %v2880_v20  ;;  %2459 = vmatprep.mubr.msk.f32.mxu0 %vm2782_vm0, %v2781_v3 }
 0xdad   :  { %2453 = vmatprep.subr.mxu0 %v2781_v3 }
 0xdae   :  { %2454 = vmatpush3.msra.mxu0 %v2885_v21 }
 0xdaf   :  { %2455 = vmatprep.subr.mxu0 %v2781_v3 }
 0xdb0   :  { %2456 = vmatpush3.msra.mxu0 %v2895_v26 }
 0xdb1   :  { %2457 = vmatprep.subr.mxu0 %v2781_v3 }
 0xdb2   :  { %2458 = vmatpush3.msra.mxu0 %v2904_v29 }
 0xdb3   :  { %2473 = vmatprep.subr.mxu0 %v2781_v3 }
 0xe6b   :  { %v870_v17 = vpop.f32.mrf.mxu0 }
 0xe6c   :  { %v874_v20 = vadd.f32 %v870_v17, %v797_v16  ;;  %v1132_v16 = vld [vmem:[%s3212_s4 + $0x8] sm:$0xff]  ;;  %v1131_v17 = vld [vmem:[%s3212_s4] sm:$0xff] }
 0xe6d   :  { %v2439_v18 = vpop.f32.mrf.mxu0 }
 0xe6e   :  { %2622 = vtanh.f32 %v874_v20  ;;  %v2243_v22 = vmul.f32 -1.442695, %v874_v20 }
 0xe70   :  { %2624 = vpow2.f32 %v2243_v22  ;;  %v3053_v22 = vld [vmem:[#allocation4 + $0x10] sm:$0xff] }
 0xe7b   :  { %v2623_v19 = vpop.eup %2622 }
 0xe7c   :  { %884 = vrot.lane.b32.xlu0 %v2623_v19, %s2783_s3  ;;  %v3051_v19 = vld [vmem:[#allocation4 + $0x18] sm:$0xff] }
 0xe7d   :  { %v2625_v21 = vpop.eup %2624 }
 0xe7e   :  { %v878_v23 = vadd.f32 1.0, %v2625_v21  ;;  %v3057_v21 = vld [vmem:[#allocation4 + $0x8] sm:$0xff] }
 0xe80   :  { %2626 = vrcp.f32 %v878_v23  ;;  %v3061_v23 = vld [vmem:[#allocation4] sm:$0xff] }
 0xe8d   :  { %v2627_v26 = vpop.eup %2626 }
 0xe8e   :  { %v882_v29 = vmul.f32 %v2627_v26, %v783_v11 }
 0xeee   :  { %v885_v24 = vpop.permute.xlu0 %884 }
 0xeef   :  { %v887_v25 = vmul.f32 %v2627_v26, %v885_v24 }
 0xef1   :  { %889 = vrot.lane.b32.xlu1 %v887_v25, %s2783_s3  ;;  %v1127_v25 = vld [vmem:[#allocation3 + $0x8] sm:$0x3] }
 0xf63   :  { %v890_v27 = vpop.permute.xlu1 %889 }
 0xf64   :  { %v892_v28 = vadd.f32 %v890_v27, %v882_v29 }
 0xf66   :  { %2628 = vtanh.f32 %v892_v28 }
 0xf73   :  { %v2629_v30 = vpop.eup %2628 }
 0xf74   :  { %895 = vrot.lane.b32.xlu0 %v2629_v30, %s2783_s3 }
 0xfe6   :  { %v896_v31 = vpop.permute.xlu0 %895 }
 0xfe7   :  { %v898_v32 = vmul.f32 %v2627_v26, %v896_v31 }
 0xfe9   :  { %900 = vrot.lane.b32.xlu1 %v898_v32, %s2784_s24 }
0x105b   :  { %v901_v41 = vpop.permute.xlu1 %900 }
0x105c   :  { %904 = vst.msk [vmem:[#allocation3 + $0xa] sm:$0x3] %vm358_vm2, %v901_v41  ;;  %2449 = vmatmul.mubr.msk.f32.vlgmr.msra.gmra.mxu1 %vm255_vm3, %v901_v41 }
0x105d   :  { %2470 = vmatprep.mubr.msk.f32.mxu1 %vm255_vm3, %v1166_v42  ;;  %2463 = vmatpush3.msra.mxu1 %v1134_v14 }
0x105e   :  { %2464 = vmatprep.subr.mxu1 %v1133_v15 }
0x105f   :  { %2465 = vmatpush3.msra.mxu1 %v1133_v15 }
0x1060   :  { %2466 = vmatprep.subr.mxu1 %v1132_v16 }
0x1061   :  { %2467 = vmatpush3.msra.mxu1 %v1132_v16 }
0x1062   :  { %2468 = vmatprep.subr.mxu1 %v1131_v17 }
0x1063   :  { %2469 = vmatpush3.msra.mxu1 %v1131_v17  ;;  %v1128_v24 = vld [vmem:[#allocation3 + $0xa] sm:$0x3] }
0x1064   :  { %2484 = vmatprep.subr.mxu1 %v2781_v3  ;;  %v1167_v29 = vcombine.low %v1127_v25, %v1128_v24 }
0x1066   :  { %v1175_v31 = vrot.slane %v1167_v29, %v2854_v9 }
0x111c   :  { %v979_v44 = vpop.f32.mrf.mxu1 }
0x111d   :  { %v983_v45 = vadd.f32 %v979_v44, %v906_v43 }
0x111e   :  { %v2450_v46 = vpop.f32.mrf.mxu1 }
0x111f   :  { %2630 = vtanh.f32 %v983_v45  ;;  %v2245_v48 = vmul.f32 -1.442695, %v983_v45 }
0x1121   :  { %2632 = vpow2.f32 %v2245_v48 }
0x112c   :  { %v2631_v47 = vpop.eup %2630 }
0x112d   :  { %993 = vrot.lane.b32.xlu0 %v2631_v47, %s2783_s3 }
0x112e   :  { %v2633_v49 = vpop.eup %2632 }
0x112f   :  { %v987_v50 = vadd.f32 1.0, %v2633_v49 }
0x1131   :  { %2634 = vrcp.f32 %v987_v50 }
0x113e   :  { %v2635_v51 = vpop.eup %2634 }
0x113f   :  { %v991_v54 = vmul.f32 %v2635_v51, %v892_v28 }
0x119f   :  { %v994_v52 = vpop.permute.xlu0 %993 }
0x11a0   :  { %v996_v53 = vmul.f32 %v2635_v51, %v994_v52 }
0x11a2   :  { %998 = vrot.lane.b32.xlu1 %v996_v53, %s2783_s3 }
0x1214   :  { %v999_v55 = vpop.permute.xlu1 %998 }
0x1215   :  { %v1001_v56 = vadd.f32 %v999_v55, %v991_v54 }
0x1217   :  { %2636 = vtanh.f32 %v1001_v56 }
0x1224   :  { %v2637_v57 = vpop.eup %2636 }
0x1225   :  { %1004 = vrot.lane.b32.xlu0 %v2637_v57, %s2783_s3 }
0x1297   :  { %v1005_v58 = vpop.permute.xlu0 %1004 }
0x1298   :  { %v1007_v59 = vmul.f32 %v2635_v51, %v1005_v58 }
0x129a   :  { %1009 = vrot.lane.b32.xlu1 %v1007_v59, %s2784_s24 }
0x130c   :  { %v1010_v60 = vpop.permute.xlu1 %1009 }
0x130d   :  { %1013 = vst.msk [vmem:[#allocation3 + $0xc] sm:$0x3] %vm358_vm2, %v1010_v60  ;;  %2460 = vmatmul.mubr.msk.f32.vlgmr.msra.gmra.mxu0 %vm255_vm3, %v1010_v60 }
0x130e   :  { %2481 = vmatprep.mubr.msk.f32.mxu0 %vm2782_vm0, %v2781_v3  ;;  %2474 = vmatpush3.msra.mxu0 %v3051_v19 }
0x130f   :  { %2475 = vmatprep.subr.mxu0 %v2781_v3 }
0x1310   :  { %2476 = vmatpush3.msra.mxu0 %v3053_v22 }
0x1311   :  { %2477 = vmatprep.subr.mxu0 %v2781_v3 }
0x1312   :  { %2478 = vmatpush3.msra.mxu0 %v3057_v21 }
0x1313   :  { %2479 = vmatprep.subr.mxu0 %v2781_v3 }
0x1314   :  { %2480 = vmatpush3.msra.mxu0 %v3061_v23  ;;  %v1129_v27 = vld [vmem:[#allocation3 + $0xc] sm:$0x3] }
0x1315   :  { %2482 = vmatmul.mubr.f32.vlgmr.msra.gmra.mxu0 %v2781_v3  ;;  %2495 = vmatprep.subr.mxu0 %v2781_v3 }
0x1316   :  { %2496 = vmatpush3.msra.mxu0 %v3051_v19  ;;  %2503 = vmatprep.mubr.msk.f32.mxu0 %vm2782_vm0, %v2781_v3 }
0x1317   :  { %2497 = vmatprep.subr.mxu0 %v2781_v3 }
0x1318   :  { %2498 = vmatpush3.msra.mxu0 %v3053_v22 }
0x1319   :  { %2499 = vmatprep.subr.mxu0 %v2781_v3 }
0x131a   :  { %2500 = vmatpush3.msra.mxu0 %v3057_v21 }
0x131b   :  { %2501 = vmatprep.subr.mxu0 %v2781_v3 }
0x131c   :  { %2502 = vmatpush3.msra.mxu0 %v3061_v23 }
0x131d   :  { %2517 = vmatprep.subr.mxu0 %v2781_v3 }
0x13cd   :  { %v1088_v62 = vpop.f32.mrf.mxu0 }
0x13ce   :  { %v1092_v63 = vadd.f32 %v1088_v62, %v1015_v61 }
0x13cf   :  { %v2461_v0 = vpop.f32.mrf.mxu0 }
0x13d0   :  { %2638 = vtanh.f32 %v1092_v63  ;;  %v2247_v2 = vmul.f32 -1.442695, %v1092_v63 }
0x13d2   :  { %2640 = vpow2.f32 %v2247_v2 }
0x13d5   :  { %v1386_v34 = vpop.f32.mrf.mxu0 }
0x13d7   :  { %v2483_v35 = vpop.f32.mrf.mxu0 }
0x13dd   :  { %v2639_v1 = vpop.eup %2638 }
0x13de   :  { %1102 = vrot.lane.b32.xlu0 %v2639_v1, %s2783_s3 }
0x13df   :  { %v2641_v4 = vpop.eup %2640 }
0x13e0   :  { %v1096_v5 = vadd.f32 1.0, %v2641_v4 }
0x13e2   :  { %2642 = vrcp.f32 %v1096_v5 }
0x13ef   :  { %v2643_v6 = vpop.eup %2642 }
0x13f0   :  { %v1100_v10 = vmul.f32 %v2643_v6, %v1001_v56 }
0x1450   :  { %v1103_v7 = vpop.permute.xlu0 %1102 }
0x1451   :  { %v1105_v8 = vmul.f32 %v2643_v6, %v1103_v7 }
0x1453   :  { %1107 = vrot.lane.b32.xlu1 %v1105_v8, %s2783_s3 }
0x14c5   :  { %v1108_v11 = vpop.permute.xlu1 %1107 }
0x14c6   :  { %v1110_v12 = vadd.f32 %v1108_v11, %v1100_v10 }
0x14c8   :  { %2644 = vtanh.f32 %v1110_v12 }
0x14d5   :  { %v2645_v13 = vpop.eup %2644 }
0x14d6   :  { %1113 = vrot.lane.b32.xlu0 %v2645_v13, %s2783_s3 }
0x1548   :  { %v1114_v20 = vpop.permute.xlu0 %1113 }
0x1549   :  { %v1116_v18 = vmul.f32 %v2643_v6, %v1114_v20 }
0x154b   :  { %1118 = vrot.lane.b32.xlu1 %v1116_v18, %s2784_s24 }
0x15bd   :  { %v1119_v26 = vpop.permute.xlu1 %1118 }
0x15be   :  { %1122 = vst.msk [vmem:[#allocation3 + $0xe] sm:$0x3] %vm358_vm2, %v1119_v26 }
0x15c5   :  { %v1130_v28 = vld [vmem:[#allocation3 + $0xe] sm:$0x3] }
0x15c6   :  { %v1168_v30 = vcombine.low %v1129_v27, %v1130_v28 }
0x15c8   :  { %v1182_v32 = vrot.slane %v1168_v30, %v2854_v9 }
0x15ca   :  { %v1183_v33 = vcombine.low %v1175_v31, %v1182_v32 }
0x15cc   :  { %2471 = vmatmul.mubr.msk.f32.vlgmr.msra.gmra.mxu1 %vm255_vm3, %v1183_v33 }
0x15cd   :  { %2485 = vmatpush3.msra.mxu1 %v3051_v19  ;;  %2492 = vmatprep.mubr.msk.f32.mxu1 %vm2782_vm0, %v2781_v3 }
0x15ce   :  { %2486 = vmatprep.subr.mxu1 %v2781_v3 }
0x15cf   :  { %2487 = vmatpush3.msra.mxu1 %v3053_v22 }
0x15d0   :  { %2488 = vmatprep.subr.mxu1 %v2781_v3 }
0x15d1   :  { %2489 = vmatpush3.msra.mxu1 %v3057_v21 }
0x15d2   :  { %2490 = vmatprep.subr.mxu1 %v2781_v3 }
0x15d3   :  { %2491 = vmatpush3.msra.mxu1 %v3061_v23 }
0x15d4   :  { %2506 = vmatprep.subr.mxu1 %v2781_v3 }
0x168c   :  { %v2472_v37 = vpop.f32.mrf.mxu1 }
0x168d   :  { %v1260_v38 = vadd.f32 %v2472_v37, %v2248_v36 }
0x168e   :  { %v1254_v39 = vpop.f32.mrf.mxu1 }
0x168f   :  { %v1282_v40 = vcombine.high %v1260_v38, %v1260_v38  ;;  %v1289_v41 = vrot.slane %v1260_v38, %v2854_v9  ;;  %2253 = vst.sshfl [vmem:[#allocation2 + $0x8] sm:$0x3 pattern:$0x76325410] %v1260_v38  ;;  %v1255_v42 = vadd.f32 %v2248_v36, %v1254_v39 }
0x1691   :  { %v1296_v43 = vrot.slane %v1282_v40, %v2854_v9  ;;  %v1297_v44 = vcombine.high %v1289_v41, %v1289_v41  ;;  %2254 = vst.sshfl [vmem:[#allocation2 + $0xc] sm:$0x3 pattern:$0x76325410] %v1282_v40  ;;  %v1265_v45 = vcombine.high %v1255_v42, %v1255_v42  ;;  %v1272_v46 = vrot.slane %v1255_v42, %v2854_v9 }
0x1692   :  { %2251 = vst.sshfl [vmem:[#allocation2] sm:$0x3 pattern:$0x76325410] %v1255_v42 }
0x1693   :  { %v1298_v47 = vcombine.high %v1296_v43, %v1296_v43  ;;  %1312 = vst [vmem:[#allocation2 + $0xa] sm:$0x3] %v1297_v44  ;;  %v1279_v48 = vrot.slane %v1265_v45, %v2854_v9  ;;  %v1280_v49 = vcombine.high %v1272_v46, %v1272_v46  ;;  %2252 = vst.sshfl [vmem:[#allocation2 + $0x4] sm:$0x3 pattern:$0x76325410] %v1265_v45 }
0x1695   :  { %1314 = vst [vmem:[#allocation2 + $0xe] sm:$0x3] %v1298_v47  ;;  %v1281_v50 = vcombine.high %v1279_v48, %v1279_v48  ;;  %1308 = vst [vmem:[#allocation2 + $0x2] sm:$0x3] %v1280_v49 }
0x1697   :  { %1310 = vst [vmem:[#allocation2 + $0x6] sm:$0x3] %v1281_v50 }
0x1699   :  { %v1315_v51 = vld [vmem:[#allocation2] sm:$0x3] }
0x169a   :  { %v1390_v52 = vadd.f32 %v1386_v34, %v1315_v51  ;;  %v1516_v25 = vld [vmem:[#allocation2 + $0x4] sm:$0x3] }
0x169c   :  { %2646 = vtanh.f32 %v1390_v52  ;;  %v2255_v54 = vmul.f32 -1.442695, %v1390_v52  ;;  %v1415_v2 = vld [vmem:[#allocation2 + $0x2] sm:$0x3] }
0x169e   :  { %2648 = vpow2.f32 %v2255_v54  ;;  %v1617_v44 = vld [vmem:[#allocation2 + $0x6] sm:$0x3] }
0x16a9   :  { %v2647_v53 = vpop.eup %2646 }
0x16aa   :  { %1400 = vrot.lane.b32.xlu0 %v2647_v53, %s2783_s3 }
0x16ab   :  { %v2649_v55 = vpop.eup %2648 }
0x16ac   :  { %v1394_v56 = vadd.f32 1.0, %v2649_v55 }
0x16ae   :  { %2650 = vrcp.f32 %v1394_v56 }
0x16bb   :  { %v2651_v57 = vpop.eup %2650 }
0x16bc   :  { %v1398_v59 = vmul.f32 0.0, %v2651_v57 }
0x171c   :  { %v1401_v58 = vpop.permute.xlu0 %1400 }
0x171d   :  { %v1403_v9 = vmul.f32 %v2651_v57, %v1401_v58 }
0x171f   :  { %1405 = vrot.lane.b32.xlu1 %v1403_v9, %s2783_s3 }
0x1791   :  { %v1406_v60 = vpop.permute.xlu1 %1405 }
0x1792   :  { %v1408_v61 = vadd.f32 %v1406_v60, %v1398_v59 }
0x1794   :  { %2652 = vtanh.f32 %v1408_v61 }
0x17a1   :  { %v2653_v62 = vpop.eup %2652 }
0x17a2   :  { %1411 = vrot.lane.b32.xlu0 %v2653_v62, %s2783_s3 }
0x1814   :  { %v1412_v63 = vpop.permute.xlu0 %1411 }
0x1815   :  { %v1414_v0 = vmul.f32 %v2651_v57, %v1412_v63 }
0x1817   :  { %1417 = vrot.lane.b32.xlu1 %v1414_v0, %s2784_s24 }
0x1889   :  { %v1418_v1 = vpop.permute.xlu1 %1417 }
0x188a   :  { %2493 = vmatmul.mubr.msk.f32.vlgmr.msra.gmra.mxu1 %vm255_vm3, %v1418_v1 }
0x188b   :  { %2507 = vmatpush3.msra.mxu1 %v3051_v19  ;;  %2514 = vmatprep.mubr.msk.f32.mxu1 %vm2782_vm0, %v2781_v3 }
0x188c   :  { %2508 = vmatprep.subr.mxu1 %v2781_v3 }
0x188d   :  { %2509 = vmatpush3.msra.mxu1 %v3053_v22 }
0x188e   :  { %2510 = vmatprep.subr.mxu1 %v2781_v3 }
0x188f   :  { %2511 = vmatpush3.msra.mxu1 %v3057_v21 }
0x1890   :  { %2512 = vmatprep.subr.mxu1 %v2781_v3 }
0x1891   :  { %2513 = vmatpush3.msra.mxu1 %v3061_v23 }
0x1892   :  { %2528 = vmatprep.subr.mxu1 %v2781_v3 }
0x194a   :  { %v1487_v4 = vpop.f32.mrf.mxu1 }
0x194b   :  { %v1491_v5 = vadd.f32 %v1487_v4, %v1415_v2 }
0x194c   :  { %v2494_v6 = vpop.f32.mrf.mxu1 }
0x194d   :  { %2654 = vtanh.f32 %v1491_v5  ;;  %v2257_v8 = vmul.f32 -1.442695, %v1491_v5 }
0x194f   :  { %2656 = vpow2.f32 %v2257_v8 }
0x195a   :  { %v2655_v7 = vpop.eup %2654 }
0x195b   :  { %1501 = vrot.lane.b32.xlu0 %v2655_v7, %s2783_s3 }
0x195c   :  { %v2657_v10 = vpop.eup %2656 }
0x195d   :  { %v1495_v11 = vadd.f32 1.0, %v2657_v10 }
0x195f   :  { %2658 = vrcp.f32 %v1495_v11 }
0x196c   :  { %v2659_v12 = vpop.eup %2658 }
0x196d   :  { %v1499_v15 = vmul.f32 %v2659_v12, %v1408_v61  ;;  %v1718_v61 = vld [vmem:[#allocation2 + $0x8] sm:$0x3] }
0x19cd   :  { %v1502_v13 = vpop.permute.xlu0 %1501 }
0x19ce   :  { %v1504_v14 = vmul.f32 %v2659_v12, %v1502_v13 }
0x19d0   :  { %1506 = vrot.lane.b32.xlu1 %v1504_v14, %s2783_s3 }
0x1a42   :  { %v1507_v16 = vpop.permute.xlu1 %1506 }
0x1a43   :  { %v1509_v17 = vadd.f32 %v1507_v16, %v1499_v15 }
0x1a45   :  { %2660 = vtanh.f32 %v1509_v17 }
0x1a52   :  { %v2661_v20 = vpop.eup %2660 }
0x1a53   :  { %1512 = vrot.lane.b32.xlu0 %v2661_v20, %s2783_s3 }
0x1ac5   :  { %v1513_v18 = vpop.permute.xlu0 %1512 }
0x1ac6   :  { %v1515_v26 = vmul.f32 %v2659_v12, %v1513_v18 }
0x1ac8   :  { %1518 = vrot.lane.b32.xlu1 %v1515_v26, %s2784_s24 }
0x1b3a   :  { %v1519_v24 = vpop.permute.xlu1 %1518 }
0x1b3b   :  { %2504 = vmatmul.mubr.msk.f32.vlgmr.msra.gmra.mxu0 %vm255_vm3, %v1519_v24 }
0x1b3c   :  { %2518 = vmatpush3.msra.mxu0 %v3051_v19  ;;  %2525 = vmatprep.mubr.msk.f32.mxu0 %vm2782_vm0, %v2781_v3 }
0x1b3d   :  { %2519 = vmatprep.subr.mxu0 %v2781_v3 }
0x1b3e   :  { %2520 = vmatpush3.msra.mxu0 %v3053_v22 }
0x1b3f   :  { %2521 = vmatprep.subr.mxu0 %v2781_v3 }
0x1b40   :  { %2522 = vmatpush3.msra.mxu0 %v3057_v21 }
0x1b41   :  { %2523 = vmatprep.subr.mxu0 %v2781_v3 }
0x1b42   :  { %2524 = vmatpush3.msra.mxu0 %v3061_v23 }
0x1b43   :  { %2539 = vmatprep.subr.mxu0 %v2781_v3 }
0x1bfb   :  { %v1588_v29 = vpop.f32.mrf.mxu0 }
0x1bfc   :  { %v1592_v27 = vadd.f32 %v1588_v29, %v1516_v25 }
0x1bfd   :  { %v2505_v28 = vpop.f32.mrf.mxu0 }
0x1bfe   :  { %2662 = vtanh.f32 %v1592_v27  ;;  %v2259_v31 = vmul.f32 -1.442695, %v1592_v27 }
0x1c00   :  { %2664 = vpow2.f32 %v2259_v31 }
0x1c0b   :  { %v2663_v30 = vpop.eup %2662 }
0x1c0c   :  { %1602 = vrot.lane.b32.xlu0 %v2663_v30, %s2783_s3 }
0x1c0d   :  { %v2665_v32 = vpop.eup %2664 }
0x1c0e   :  { %v1596_v33 = vadd.f32 1.0, %v2665_v32 }
0x1c10   :  { %2666 = vrcp.f32 %v1596_v33 }
0x1c1d   :  { %v2667_v34 = vpop.eup %2666 }
0x1c1e   :  { %v1600_v37 = vmul.f32 %v2667_v34, %v1509_v17  ;;  %v1819_v17 = vld [vmem:[#allocation2 + $0xa] sm:$0x3] }
0x1c7e   :  { %v1603_v35 = vpop.permute.xlu0 %1602 }
0x1c7f   :  { %v1605_v36 = vmul.f32 %v2667_v34, %v1603_v35  ;;  %v1920_v35 = vld [vmem:[#allocation2 + $0xc] sm:$0x3] }
0x1c81   :  { %1607 = vrot.lane.b32.xlu1 %v1605_v36, %s2783_s3 }
0x1cf3   :  { %v1608_v38 = vpop.permute.xlu1 %1607 }
0x1cf4   :  { %v1610_v39 = vadd.f32 %v1608_v38, %v1600_v37 }
0x1cf6   :  { %2668 = vtanh.f32 %v1610_v39 }
0x1d03   :  { %v2669_v40 = vpop.eup %2668 }
0x1d04   :  { %1613 = vrot.lane.b32.xlu0 %v2669_v40, %s2783_s3 }
0x1d76   :  { %v1614_v41 = vpop.permute.xlu0 %1613 }
0x1d77   :  { %v1616_v42 = vmul.f32 %v2667_v34, %v1614_v41 }
0x1d79   :  { %1619 = vrot.lane.b32.xlu1 %v1616_v42, %s2784_s24 }
0x1deb   :  { %v1620_v43 = vpop.permute.xlu1 %1619 }
0x1dec   :  { %2515 = vmatmul.mubr.msk.f32.vlgmr.msra.gmra.mxu1 %vm255_vm3, %v1620_v43 }
0x1ded   :  { %2529 = vmatpush3.msra.mxu1 %v3051_v19  ;;  %2536 = vmatprep.mubr.msk.f32.mxu1 %vm2782_vm0, %v2781_v3 }
0x1dee   :  { %2530 = vmatprep.subr.mxu1 %v2781_v3 }
0x1def   :  { %2531 = vmatpush3.msra.mxu1 %v3053_v22 }
0x1df0   :  { %2532 = vmatprep.subr.mxu1 %v2781_v3 }
0x1df1   :  { %2533 = vmatpush3.msra.mxu1 %v3057_v21 }
0x1df2   :  { %2534 = vmatprep.subr.mxu1 %v2781_v3 }
0x1df3   :  { %2535 = vmatpush3.msra.mxu1 %v3061_v23 }
0x1df4   :  { %2550 = vmatprep.subr.mxu1 %v2781_v3 }
0x1eac   :  { %v1689_v45 = vpop.f32.mrf.mxu1 }
0x1ead   :  { %v1693_v46 = vadd.f32 %v1689_v45, %v1617_v44 }
0x1eae   :  { %v2516_v47 = vpop.f32.mrf.mxu1 }
0x1eaf   :  { %2670 = vtanh.f32 %v1693_v46  ;;  %v2261_v49 = vmul.f32 -1.442695, %v1693_v46 }
0x1eb1   :  { %2672 = vpow2.f32 %v2261_v49 }
0x1ebc   :  { %v2671_v48 = vpop.eup %2670 }
0x1ebd   :  { %1703 = vrot.lane.b32.xlu0 %v2671_v48, %s2783_s3 }
0x1ebe   :  { %v2673_v50 = vpop.eup %2672 }
0x1ebf   :  { %v1697_v51 = vadd.f32 1.0, %v2673_v50 }
0x1ec1   :  { %2674 = vrcp.f32 %v1697_v51 }
0x1ece   :  { %v2675_v52 = vpop.eup %2674 }
0x1ecf   :  { %v1701_v55 = vmul.f32 %v2675_v52, %v1610_v39 }
0x1f2f   :  { %v1704_v53 = vpop.permute.xlu0 %1703 }
0x1f30   :  { %v1706_v54 = vmul.f32 %v2675_v52, %v1704_v53  ;;  %v2021_v53 = vld [vmem:[#allocation2 + $0xe] sm:$0x3] }
0x1f32   :  { %1708 = vrot.lane.b32.xlu1 %v1706_v54, %s2783_s3 }
0x1fa4   :  { %v1709_v56 = vpop.permute.xlu1 %1708 }
0x1fa5   :  { %v1711_v57 = vadd.f32 %v1709_v56, %v1701_v55 }
0x1fa7   :  { %2676 = vtanh.f32 %v1711_v57 }
0x1fb4   :  { %v2677_v58 = vpop.eup %2676 }
0x1fb5   :  { %1714 = vrot.lane.b32.xlu0 %v2677_v58, %s2783_s3 }
0x2027   :  { %v1715_v9 = vpop.permute.xlu0 %1714 }
0x2028   :  { %v1717_v59 = vmul.f32 %v2675_v52, %v1715_v9 }
0x202a   :  { %1720 = vrot.lane.b32.xlu1 %v1717_v59, %s2784_s24 }
0x209c   :  { %v1721_v60 = vpop.permute.xlu1 %1720 }
0x209d   :  { %2526 = vmatmul.mubr.msk.f32.vlgmr.msra.gmra.mxu0 %vm255_vm3, %v1721_v60 }
0x209e   :  { %2540 = vmatpush3.msra.mxu0 %v3051_v19  ;;  %2547 = vmatprep.mubr.msk.f32.mxu0 %vm2782_vm0, %v2781_v3 }
0x209f   :  { %2541 = vmatprep.subr.mxu0 %v2781_v3 }
0x20a0   :  { %2542 = vmatpush3.msra.mxu0 %v3053_v22 }
0x20a1   :  { %2543 = vmatprep.subr.mxu0 %v2781_v3 }
0x20a2   :  { %2544 = vmatpush3.msra.mxu0 %v3057_v21 }
0x20a3   :  { %2545 = vmatprep.subr.mxu0 %v2781_v3 }
0x20a4   :  { %2546 = vmatpush3.msra.mxu0 %v3061_v23 }
0x20a5   :  { %2561 = vmatprep.subr.mxu0 %v2781_v3 }
0x215d   :  { %v1790_v62 = vpop.f32.mrf.mxu0 }
0x215e   :  { %v1794_v63 = vadd.f32 %v1790_v62, %v1718_v61 }
0x215f   :  { %v2527_v0 = vpop.f32.mrf.mxu0 }
0x2160   :  { %2678 = vtanh.f32 %v1794_v63  ;;  %v2263_v2 = vmul.f32 -1.442695, %v1794_v63 }
0x2162   :  { %2680 = vpow2.f32 %v2263_v2  ;;  %v2125_v2 = vld [vmem:[%s3215_s7 + $0x18] sm:$0xff] }
0x216d   :  { %v2679_v1 = vpop.eup %2678 }
0x216e   :  { %1804 = vrot.lane.b32.xlu0 %v2679_v1, %s2783_s3 }
0x216f   :  { %v2681_v4 = vpop.eup %2680 }
0x2170   :  { %v1798_v5 = vadd.f32 1.0, %v2681_v4  ;;  %v2124_v4 = vld [vmem:[%s3215_s7 + $0x10] sm:$0xff] }
0x2172   :  { %2682 = vrcp.f32 %v1798_v5  ;;  %v2123_v5 = vld [vmem:[%s3215_s7 + $0x8] sm:$0xff] }
0x217f   :  { %v2683_v6 = vpop.eup %2682 }
0x2180   :  { %v1802_v10 = vmul.f32 %v2683_v6, %v1711_v57 }
0x21e0   :  { %v1805_v7 = vpop.permute.xlu0 %1804 }
0x21e1   :  { %v1807_v8 = vmul.f32 %v2683_v6, %v1805_v7 }
0x21e3   :  { %1809 = vrot.lane.b32.xlu1 %v1807_v8, %s2783_s3 }
0x2255   :  { %v1810_v11 = vpop.permute.xlu1 %1809 }
0x2256   :  { %v1812_v12 = vadd.f32 %v1810_v11, %v1802_v10 }
0x2258   :  { %2684 = vtanh.f32 %v1812_v12 }
0x2265   :  { %v2685_v13 = vpop.eup %2684 }
0x2266   :  { %1815 = vrot.lane.b32.xlu0 %v2685_v13, %s2783_s3 }
0x22d8   :  { %v1816_v14 = vpop.permute.xlu0 %1815 }
0x22d9   :  { %v1818_v15 = vmul.f32 %v2683_v6, %v1816_v14  ;;  %v2122_v6 = vld [vmem:[%s3215_s7] sm:$0xff]  ;;  %s2750_s7 = scalar_lea.vmem %s2217_s20, 32 }
0x22da   :  { %p2751_p10 = scmp.ne.s32.totalorder %s2217_s20, %s2750_s7  ;;  %p2756_p12 = scmp.lt.s32.totalorder %s2750_s7, %s2750_s7 }
0x22db   :  { %1821 = vrot.lane.b32.xlu1 %v1818_v15, %s2784_s24 }
0x22dc   :  { %p2757_p13 = por %p2756_p12, %p2755_p11 }
0x22de   :  { %p2758_p0 = pnand %p2757_p13, %p2751_p10 }
0x234d   :  { %v1822_v16 = vpop.permute.xlu1 %1821 }
0x234e   :  { %2537 = vmatmul.mubr.msk.f32.vlgmr.msra.gmra.mxu1 %vm255_vm3, %v1822_v16 }
0x234f   :  { %2551 = vmatpush3.msra.mxu1 %v3051_v19  ;;  %2558 = vmatprep.mubr.msk.f32.mxu1 %vm2782_vm0, %v2781_v3 }
0x2350   :  { %2552 = vmatprep.subr.mxu1 %v2781_v3 }
0x2351   :  { %2553 = vmatpush3.msra.mxu1 %v3053_v22 }
0x2352   :  { %2554 = vmatprep.subr.mxu1 %v2781_v3 }
0x2353   :  { %2555 = vmatpush3.msra.mxu1 %v3057_v21 }
0x2354   :  { %2556 = vmatprep.subr.mxu1 %v2781_v3 }
0x2355   :  { %2557 = vmatpush3.msra.mxu1 %v3061_v23 }
0x240e   :  { %v1891_v20 = vpop.f32.mrf.mxu1 }
0x240f   :  { %v1895_v18 = vadd.f32 %v1891_v20, %v1819_v17 }
0x2410   :  { %v2538_v26 = vpop.f32.mrf.mxu1 }
0x2411   :  { %2686 = vtanh.f32 %v1895_v18  ;;  %v2265_v24 = vmul.f32 -1.442695, %v1895_v18 }
0x2413   :  { %2688 = vpow2.f32 %v2265_v24 }
0x241e   :  { %v2687_v19 = vpop.eup %2686 }
0x241f   :  { %1905 = vrot.lane.b32.xlu0 %v2687_v19, %s2783_s3 }
0x2420   :  { %v2689_v25 = vpop.eup %2688 }
0x2421   :  { %v1899_v22 = vadd.f32 1.0, %v2689_v25 }
0x2423   :  { %2690 = vrcp.f32 %v1899_v22 }
0x2430   :  { %v2691_v29 = vpop.eup %2690 }
0x2431   :  { %v1903_v28 = vmul.f32 %v2691_v29, %v1812_v12  ;;  %v2270_v12 = vld [vmem:[#allocation7] ss:$0 sm:$0xff] }
0x2491   :  { %v1906_v27 = vpop.permute.xlu0 %1905 }
0x2492   :  { %v1908_v21 = vmul.f32 %v2691_v29, %v1906_v27 }
0x2494   :  { %1910 = vrot.lane.b32.xlu1 %v1908_v21, %s2783_s3 }
0x2506   :  { %v1911_v23 = vpop.permute.xlu1 %1910 }
0x2507   :  { %v1913_v30 = vadd.f32 %v1911_v23, %v1903_v28 }
0x2509   :  { %2692 = vtanh.f32 %v1913_v30 }
0x2516   :  { %v2693_v31 = vpop.eup %2692 }
0x2517   :  { %1916 = vrot.lane.b32.xlu0 %v2693_v31, %s2783_s3 }
0x2589   :  { %v1917_v32 = vpop.permute.xlu0 %1916 }
0x258a   :  { %v1919_v33 = vmul.f32 %v2691_v29, %v1917_v32 }
0x258c   :  { %1922 = vrot.lane.b32.xlu1 %v1919_v33, %s2784_s24 }
0x25fe   :  { %v1923_v34 = vpop.permute.xlu1 %1922 }
0x25ff   :  { %2548 = vmatmul.mubr.msk.f32.vlgmr.msra.gmra.mxu0 %vm255_vm3, %v1923_v34 }
0x2600   :  { %2569 = vmatprep.mubr.msk.f32.mxu0 %vm2782_vm0, %v2781_v3  ;;  %2562 = vmatpush3.msra.mxu0 %v2125_v2 }
0x2601   :  { %2563 = vmatprep.subr.mxu0 %v2781_v3 }
0x2602   :  { %2564 = vmatpush3.msra.mxu0 %v2124_v4 }
0x2603   :  { %2565 = vmatprep.subr.mxu0 %v2781_v3 }
0x2604   :  { %2566 = vmatpush3.msra.mxu0 %v2123_v5 }
0x2605   :  { %2567 = vmatprep.subr.mxu0 %v2781_v3 }
0x2606   :  { %2568 = vmatpush3.msra.mxu0 %v2122_v6 }
0x26bf   :  { %v1992_v36 = vpop.f32.mrf.mxu0 }
0x26c0   :  { %v1996_v37 = vadd.f32 %v1992_v36, %v1920_v35 }
0x26c1   :  { %v2549_v38 = vpop.f32.mrf.mxu0 }
0x26c2   :  { %2694 = vtanh.f32 %v1996_v37  ;;  %v2267_v40 = vmul.f32 -1.442695, %v1996_v37 }
0x26c4   :  { %2696 = vpow2.f32 %v2267_v40 }
0x26cf   :  { %v2695_v39 = vpop.eup %2694 }
0x26d0   :  { %2006 = vrot.lane.b32.xlu0 %v2695_v39, %s2783_s3 }
0x26d1   :  { %v2697_v41 = vpop.eup %2696 }
0x26d2   :  { %v2000_v42 = vadd.f32 1.0, %v2697_v41 }
0x26d4   :  { %2698 = vrcp.f32 %v2000_v42 }
0x26e1   :  { %v2699_v43 = vpop.eup %2698 }
0x26e2   :  { %v2004_v46 = vmul.f32 %v2699_v43, %v1913_v30 }
0x2742   :  { %v2007_v44 = vpop.permute.xlu0 %2006 }
0x2743   :  { %v2009_v45 = vmul.f32 %v2699_v43, %v2007_v44 }
0x2745   :  { %2011 = vrot.lane.b32.xlu1 %v2009_v45, %s2783_s3 }
0x27b7   :  { %v2012_v47 = vpop.permute.xlu1 %2011 }
0x27b8   :  { %v2014_v48 = vadd.f32 %v2012_v47, %v2004_v46 }
0x27ba   :  { %2700 = vtanh.f32 %v2014_v48 }
0x27c7   :  { %v2701_v49 = vpop.eup %2700 }
0x27c8   :  { %2017 = vrot.lane.b32.xlu0 %v2701_v49, %s2783_s3 }
0x283a   :  { %v2018_v50 = vpop.permute.xlu0 %2017 }
0x283b   :  { %v2020_v51 = vmul.f32 %v2699_v43, %v2018_v50 }
0x283d   :  { %2023 = vrot.lane.b32.xlu1 %v2020_v51, %s2784_s24 }
0x28af   :  { %v2024_v52 = vpop.permute.xlu1 %2023 }
0x28b0   :  { %2559 = vmatmul.mubr.msk.f32.vlgmr.msra.gmra.mxu1 %vm255_vm3, %v2024_v52 }
0x2970   :  { %v2093_v54 = vpop.f32.mrf.mxu1 }
0x2971   :  { %v2097_v55 = vadd.f32 %v2093_v54, %v2021_v53 }
0x2972   :  { %v2560_v56 = vpop.f32.mrf.mxu1 }
0x2973   :  { %2702 = vtanh.f32 %v2097_v55  ;;  %v2269_v58 = vmul.f32 -1.442695, %v2097_v55 }
0x2975   :  { %2704 = vpow2.f32 %v2269_v58 }
0x2980   :  { %v2703_v57 = vpop.eup %2702 }
0x2981   :  { %2107 = vrot.lane.b32.xlu0 %v2703_v57, %s2783_s3 }
0x2982   :  { %v2705_v9 = vpop.eup %2704 }
0x2983   :  { %v2101_v59 = vadd.f32 1.0, %v2705_v9 }
0x2985   :  { %2706 = vrcp.f32 %v2101_v59 }
0x2992   :  { %v2707_v60 = vpop.eup %2706 }
0x2993   :  { %v2105_v63 = vmul.f32 %v2707_v60, %v2014_v48 }
0x29f3   :  { %v2108_v61 = vpop.permute.xlu0 %2107 }
0x29f4   :  { %v2110_v62 = vmul.f32 %v2707_v60, %v2108_v61 }
0x29f6   :  { %2112 = vrot.lane.b32.xlu1 %v2110_v62, %s2783_s3 }
0x2a68   :  { %v2113_v0 = vpop.permute.xlu1 %2112 }
0x2a69   :  { %v2115_v1 = vadd.f32 %v2113_v0, %v2105_v63 }
0x2a6b   :  { %2708 = vtanh.f32 %v2115_v1 }
0x2a78   :  { %v2709_v7 = vpop.eup %2708 }
0x2a79   :  { %2118 = vrot.lane.b32.xlu0 %v2709_v7, %s2783_s3 }
0x2aeb   :  { %v2119_v8 = vpop.permute.xlu0 %2118 }
0x2aec   :  { %v2121_v10 = vmul.f32 %v2707_v60, %v2119_v8 }
0x2aee   :  { %2134 = vrot.lane.b32.xlu1 %v2121_v10, %s2784_s24 }
0x2b60   :  { %v2135_v11 = vpop.permute.xlu1 %2134 }
0x2b61   :  { %2570 = vmatmul.mubr.msk.f32.vlgmr.msra.gmra.mxu0 %vm255_vm3, %v2135_v11 }
0x2c21   :  { %v2204_v13 = vpop.f32.mrf.mxu0 }
0x2c22   :  { %v2205_v14 = vadd.f32 %v2270_v12, %v2204_v13 }
0x2c23   :  { %v2571_v15 = vpop.f32.mrf.mxu0 }
0x2c24   :  { %2209 = vst.msk [vmem:[#allocation9] sm:$0x3] %vm2208_vm4, %v2205_v14 }
0x2c25   :  { %2761 = shalt.err (!%p2758_p0)
}
0x2c26   :  { %2219 = dma.vmem_to_hbm [thread:$0]  %s2217_s20, 32, %s3217_s9, [#allocation6]  }
0x2c27   :  { %2774 = dma.done.wait [#allocation6], 32  }
0x2c28   :  { %2775 = vsyncadd [#allocation6], 4294967264 }
0x2c29   :  { %2223 = vsyncpa [#allocation5], 1 }
0x2c2a   :  { %2224 = vsyncpa [#allocation8], 1 }
0x2c2b   :  { %2225 = vsyncpa [#allocation6], 1 }

</bundles_post_ra>
